<compile_context>
chip_gen: v6e
topology: v6e:2x2x1
jax: 0.10.0
libtpu: 0.0.40
codegen_flags: <defaults>
</compile_context>

<pallas_src>
import functools

import jax
import jax.numpy as jnp
import numpy as np
from jax.experimental import pallas as pl
from jax.experimental.pallas import tpu as pltpu


# ----------------------------- Pallas kernel ---------------------------------

def _layer_norm(h, gamma, beta, eps=1e-5):
    mu = jnp.mean(h, axis=-1, keepdims=True)
    var = jnp.mean((h - mu) * (h - mu), axis=-1, keepdims=True)
    return (h - mu) * jax.lax.rsqrt(var + eps) * gamma + beta


def transformer_layer_kernel(
    x_ref, mask_ref,
    wqkv_ref, wo3_ref,
    w1_ref, b1_ref, w2_ref, b2_ref,
    ln_d_ref, an_ref, ln_2d_ref,
    out_ref,
    *, n_heads,
):
    f32 = jnp.float32
    bf16 = jnp.bfloat16

    # One batch element per grid step: refs are (1, N, D) / (1, N, N).
    x = x_ref[0].astype(f32)          # (N, D)
    mask = mask_ref[0].astype(f32)    # (N, N), streamed as bf16

    N, D = x.shape
    H = n_heads
    dh = D // H

    # LayerNorm(dim) params: rows [n1_g, n1_b, n2_g, n2_b]
    n1_g, n1_b = ln_d_ref[0], ln_d_ref[1]
    n2_g, n2_b = ln_d_ref[2], ln_d_ref[3]
    # attn-output LayerNorm params, already head-shaped host-side: (2, H, 1, dh)
    an_g = an_ref[0]                  # (H, 1, dh)
    an_b = an_ref[1]
    # LayerNorm(2*dim) params for the FFN
    ffn_g, ffn_b = ln_2d_ref[0], ln_2d_ref[1]

    # ---------------- attention branch: x + attn(n1(x), mask) ----------------
    h = _layer_norm(x, n1_g, n1_b)                                    # (N, D) f32

    # Fused QKV projection: one wide bf16 MXU pass with f32 accumulation.
    qkv = jnp.dot(h.astype(bf16), wqkv_ref[...],
                  preferred_element_type=f32)                         # (N, 3D) f32

    # Split into head-major (H, N, dh) tensors once (static slices + stack).
    def split_heads(col_off):
        return jnp.stack(
            [qkv[:, col_off + i * dh: col_off + (i + 1) * dh] for i in range(H)],
            axis=0)

    q3 = split_heads(0)           # (H, N, dh)
    k3 = split_heads(D)
    v3 = split_heads(2 * D)

    # Batched-head attention (leading batch dim -> single MXU-friendly dot_general).
    sim = jnp.einsum('hnd,hsd->hns', q3.astype(bf16), k3.astype(bf16),
                     preferred_element_type=f32) + mask               # (H, N, N) f32
    sim = sim - jnp.max(sim, axis=-1, keepdims=True)
    e = jnp.exp(sim)
    attn = e * pl.reciprocal(jnp.sum(e, axis=-1, keepdims=True), approx=True)

    # Divide-after-softmax (module quirk), folded into v: (attn*c) @ v == attn @ (c*v).
    inv_sqrt_dh = 1.0 / (float(dh) ** 0.5)
    v3s = v3 * inv_sqrt_dh
    ctx3 = jnp.einsum('hns,hsd->hnd', attn.astype(bf16), v3s.astype(bf16),
                      preferred_element_type=f32)                     # (H, N, dh) f32

    # LayerNorm over the full (concatenated) feature dim, computed in head space.
    eps = 1e-5
    mu = jnp.sum(jnp.sum(ctx3, axis=2, keepdims=True), axis=0, keepdims=True) / D
    diff = ctx3 - mu
    var = jnp.sum(jnp.sum(diff * diff, axis=2, keepdims=True),
                  axis=0, keepdims=True) / D
    lnctx = diff * jax.lax.rsqrt(var + eps) * an_g + an_b             # (H, N, dh)

    # Output projection, still in head space: sum_h lnctx_h @ wo_h  -> (N, D).
    attn_out = jnp.sum(
        jnp.einsum('hnd,hde->hne', lnctx.astype(bf16), wo3_ref[...],
                   preferred_element_type=f32),
        axis=0)                                                       # (N, D) f32
    x1 = x + attn_out

    # ---------------- feed-forward branch: x1 + pos_ff(n2(x1)) ----------------
    g = _layer_norm(x1, n2_g, n2_b)                                   # (N, D) f32
    a = jnp.dot(g.astype(bf16), w1_ref[...],
                preferred_element_type=f32) + b1_ref[0]               # (N, 2D) f32
    a = a * jax.nn.sigmoid(a)                                         # SiLU
    a = _layer_norm(a, ffn_g, ffn_b)
    ff = jnp.dot(a.astype(bf16), w2_ref[...],
                 preferred_element_type=f32) + b2_ref[0]              # (N, D) f32

    out_ref[0] = (x1 + ff + g).astype(out_ref.dtype)                  # pos_ff adds its own input g


# ----------------------------- host-side wrapper ------------------------------

def transformer_layer(x, mask, kparams, *, n_heads):
    B, N, D = x.shape
    H = n_heads
    dh = D // H
    (wqkv, wo3, w1, b1, w2, b2, ln_d, an, ln_2d) = kparams

    kern = functools.partial(transformer_layer_kernel, n_heads=n_heads)

    full2 = lambda b: (0, 0)
    full3 = lambda b: (0, 0, 0)
    full4 = lambda b: (0, 0, 0, 0)
    batch3 = lambda b: (b, 0, 0)

    return pl.pallas_call(
        kern,
        out_shape=jax.ShapeDtypeStruct((B, N, D), x.dtype),
        grid_spec=pltpu.PrefetchScalarGridSpec(
            num_scalar_prefetch=0,
            grid=(B,),
            in_specs=[
                pl.BlockSpec((1, N, D), batch3),       # x (f32)
                pl.BlockSpec((1, N, N), batch3),       # mask (bf16)
                pl.BlockSpec((D, 3 * D), full2),       # fused wqkv (bf16)
                pl.BlockSpec((H, dh, D), full3),       # wo, head-major (bf16)
                pl.BlockSpec((D, 2 * D), full2),       # w1 (bf16)
                pl.BlockSpec((1, 2 * D), full2),       # b1 (f32)
                pl.BlockSpec((2 * D, D), full2),       # w2 (bf16)
                pl.BlockSpec((1, D), full2),           # b2 (f32)
                pl.BlockSpec((4, D), full2),           # n1/n2 LayerNorm params (f32)
                pl.BlockSpec((2, H, 1, dh), full4),    # attn-out LayerNorm params (f32)
                pl.BlockSpec((2, 2 * D), full2),       # FFN LayerNorm(2D) params (f32)
            ],
            out_specs=pl.BlockSpec((1, N, D), batch3),
        ),
        compiler_params=pltpu.CompilerParams(
            dimension_semantics=("parallel",),         # shard batch over TCs on v7x
            vmem_limit_bytes=48 * 1024 * 1024,
        ),
    )(x, mask, wqkv, wo3, w1, b1, w2, b2, ln_d, an, ln_2d)


# ----------------------------- parameter handling ------------------------------

def xavier_uniform(key, fan_in, fan_out):
    bound = (6.0 / (fan_in + fan_out)) ** 0.5
    return jax.random.uniform(key, (fan_in, fan_out), jnp.float32, -bound, bound)


def init_canonical_params(key, dim):
    """Plain f32 parameters in the PyTorch layout ((in, out) weights, x @ W convention)."""
    ks = jax.random.split(key, 14)
    p = dict(
        wq=xavier_uniform(ks[0], dim, dim),
        wk=xavier_uniform(ks[1], dim, dim),
        wv=xavier_uniform(ks[2], dim, dim),
        wo=xavier_uniform(ks[3], dim, dim),
        w1=xavier_uniform(ks[4], dim, 2 * dim),
        w2=xavier_uniform(ks[5], 2 * dim, dim),
        b1=(0.01 * jax.random.normal(ks[6], (2 * dim,))).astype(jnp.float32),
        b2=(0.01 * jax.random.normal(ks[7], (dim,))).astype(jnp.float32),
        # LayerNorm params (slightly perturbed from the PyTorch 1/0 defaults so the
        # gamma/beta code path is actually exercised).
        n1_g=1.0 + 0.1 * jax.random.normal(ks[8], (dim,)),
        n1_b=0.05 * jax.random.normal(ks[9], (dim,)),
        n2_g=1.0 + 0.1 * jax.random.normal(ks[10], (dim,)),
        n2_b=0.05 * jax.random.normal(ks[11], (dim,)),
        an_g=1.0 + 0.1 * jax.random.normal(ks[12], (dim,)),
        an_b=0.05 * jax.random.normal(ks[12], (dim,)),
        ffn_g=1.0 + 0.1 * jax.random.normal(ks[13], (2 * dim,)),
        ffn_b=0.05 * jax.random.normal(ks[13], (2 * dim,)),
    )
    return {k: v.astype(jnp.float32) for k, v in p.items()}


def pack_kernel_params(p, *, dim, n_heads):
    """Repack canonical params into the kernel's layout (fused QKV, head-major wo, bf16 weights)."""
    dh = dim // n_heads
    wqkv = jnp.concatenate([p["wq"], p["wk"], p["wv"]], axis=1).astype(jnp.bfloat16)  # (D, 3D)
    wo3 = p["wo"].reshape(n_heads, dh, dim).astype(jnp.bfloat16)                       # (H, dh, D)
    w1 = p["w1"].astype(jnp.bfloat16)
    w2 = p["w2"].astype(jnp.bfloat16)
    b1 = p["b1"].reshape(1, 2 * dim)
    b2 = p["b2"].reshape(1, dim)
    ln_d = jnp.stack([p["n1_g"], p["n1_b"], p["n2_g"], p["n2_b"]]).astype(jnp.float32)  # (4, D)
    an = jnp.stack([p["an_g"], p["an_b"]]).reshape(2, n_heads, 1, dh).astype(jnp.float32)
    ln_2d = jnp.stack([p["ffn_g"], p["ffn_b"]]).astype(jnp.float32)                     # (2, 2D)
    return (wqkv, wo3, w1, b1, w2, b2, ln_d, an, ln_2d)


# ----------------------------- reference (pure JAX) ---------------------------

def reference_forward(x, mask, p, *, n_heads):
    """Mirrors the PyTorch module; matmul operands cast to bf16 with f32 accumulation
    to match the kernel's MXU numerics."""
    f32, bf = jnp.float32, (lambda t: t.astype(jnp.bfloat16))
    B, N, D = x.shape
    dh = D // n_heads

    def ln(h, g, b, eps=1e-5):
        mu = h.mean(-1, keepdims=True)
        var = ((h - mu) ** 2).mean(-1, keepdims=True)
        return (h - mu) * jax.lax.rsqrt(var + eps) * g + b

    h = ln(x, p["n1_g"], p["n1_b"])
    q = jnp.dot(bf(h), bf(p["wq"]), preferred_element_type=f32)
    k = jnp.dot(bf(h), bf(p["wk"]), preferred_element_type=f32)
    v = jnp.dot(bf(h), bf(p["wv"]), preferred_element_type=f32)
    q = q.reshape(B, N, n_heads, dh).transpose(0, 2, 1, 3)
    k = k.reshape(B, N, n_heads, dh).transpose(0, 2, 1, 3)
    v = v.reshape(B, N, n_heads, dh).transpose(0, 2, 1, 3)

    sim = jnp.einsum('bhnd,bhsd->bhns', bf(q), bf(k),
                     preferred_element_type=f32) + mask.astype(f32)[:, None]
    attn = jax.nn.softmax(sim, axis=-1) / (dh ** 0.5)        # divide AFTER softmax (module quirk)
    ctx = jnp.einsum('bhns,bhsd->bhnd', bf(attn), bf(v),
                     preferred_element_type=f32).transpose(0, 2, 1, 3).reshape(B, N, D)
    attn_out = jnp.dot(bf(ln(ctx, p["an_g"], p["an_b"])), bf(p["wo"]),
                       preferred_element_type=f32)
    x1 = x + attn_out

    g = ln(x1, p["n2_g"], p["n2_b"])
    a = jnp.dot(bf(g), bf(p["w1"]), preferred_element_type=f32) + p["b1"]
    a = a * jax.nn.sigmoid(a)
    a = ln(a, p["ffn_g"], p["ffn_b"])
    ff = jnp.dot(bf(a), bf(p["w2"]), preferred_element_type=f32) + p["b2"]
    return x1 + ff + g


# ----------------------------- main -------------------------------------------

if __name__ == "__main__":
    B, N, D, H = 2, 8, 32, 4
    key = jax.random.PRNGKey(0)
    kx, kmask, kparams = jax.random.split(key, 3)

    x = jax.random.normal(kx, (B, N, D), jnp.float32)
    # Additive attention mask (b, n, s); module broadcasts it over heads. Streamed as bf16.
    mask = (0.1 * jax.random.normal(kmask, (B, N, N), jnp.float32)).astype(jnp.bfloat16)

    canon = init_canonical_params(kparams, D)
    packed = pack_kernel_params(canon, dim=D, n_heads=H)

    out = transformer_layer(x, mask, packed, n_heads=H)
    out = jax.block_until_ready(out)

    ref = reference_forward(x, mask, canon, n_heads=H)
    # Tolerance covers bf16 operand rounding, the approx softmax reciprocal, and the
    # scale-fold into v; everything else is f32-accumulated and matches tightly.
    np.testing.assert_allclose(np.asarray(out), np.asarray(ref), rtol=2e-2, atol=2e-2)

    print("KERNEL_OK")
</pallas_src>

<mosaic_0001>
module attributes {stable_mosaic.version = 11 : i64} {
  func.func @transformer_layer_kernel(%arg0: i32, %arg1: memref<1x8x32xf32, #tpu.memory_space<vmem>>, %arg2: memref<1x8x8xbf16, #tpu.memory_space<vmem>>, %arg3: memref<32x96xbf16, #tpu.memory_space<vmem>>, %arg4: memref<4x8x32xbf16, #tpu.memory_space<vmem>>, %arg5: memref<32x64xbf16, #tpu.memory_space<vmem>>, %arg6: memref<1x64xf32, #tpu.memory_space<vmem>>, %arg7: memref<64x32xbf16, #tpu.memory_space<vmem>>, %arg8: memref<1x32xf32, #tpu.memory_space<vmem>>, %arg9: memref<4x32xf32, #tpu.memory_space<vmem>>, %arg10: memref<2x4x1x8xf32, #tpu.memory_space<vmem>>, %arg11: memref<2x64xf32, #tpu.memory_space<vmem>>, %arg12: memref<1x8x32xf32, #tpu.memory_space<vmem>>) attributes {dimension_semantics = [#tpu.dimension_semantics<parallel>], iteration_bounds = array<i64: 2>, scalar_prefetch = 0 : i64, scratch_operands = 0 : i64, tpu.core_type = #tpu.core_type<tc>, window_params = [{transform_indices = @transform_0, window_bounds = array<i64: 1, 8, 32>}, {transform_indices = @transform_1, window_bounds = array<i64: 1, 8, 8>}, {pipeline_mode = #tpu.pipeline_mode<synchronous>, transform_indices = @transform_2, window_bounds = array<i64: 32, 96>}, {pipeline_mode = #tpu.pipeline_mode<synchronous>, transform_indices = @transform_3, window_bounds = array<i64: 4, 8, 32>}, {pipeline_mode = #tpu.pipeline_mode<synchronous>, transform_indices = @transform_4, window_bounds = array<i64: 32, 64>}, {pipeline_mode = #tpu.pipeline_mode<synchronous>, transform_indices = @transform_5, window_bounds = array<i64: 1, 64>}, {pipeline_mode = #tpu.pipeline_mode<synchronous>, transform_indices = @transform_6, window_bounds = array<i64: 64, 32>}, {pipeline_mode = #tpu.pipeline_mode<synchronous>, transform_indices = @transform_7, window_bounds = array<i64: 1, 32>}, {pipeline_mode = #tpu.pipeline_mode<synchronous>, transform_indices = @transform_8, window_bounds = array<i64: 4, 32>}, {pipeline_mode = #tpu.pipeline_mode<synchronous>, transform_indices = @transform_9, window_bounds = array<i64: 2, 4, 1, 8>}, {pipeline_mode = #tpu.pipeline_mode<synchronous>, transform_indices = @transform_10, window_bounds = array<i64: 2, 64>}, {transform_indices = @transform_11, window_bounds = array<i64: 1, 8, 32>}]} {
    %c0 = arith.constant 0 : index
    %c0_0 = arith.constant 0 : index
    %c0_1 = arith.constant 0 : index
    %0 = vector.load %arg1[%c0, %c0_0, %c0_1] : memref<1x8x32xf32, #tpu.memory_space<vmem>>, vector<1x8x32xf32>
    %1 = vector.shape_cast %0 : vector<1x8x32xf32> to vector<8x32xf32>
    %c0_2 = arith.constant 0 : index
    %c0_3 = arith.constant 0 : index
    %c0_4 = arith.constant 0 : index
    %2 = vector.load %arg2[%c0_2, %c0_3, %c0_4] : memref<1x8x8xbf16, #tpu.memory_space<vmem>>, vector<1x8x8xbf16>
    %3 = vector.shape_cast %2 : vector<1x8x8xbf16> to vector<8x8xbf16>
    %4 = arith.extf %3 : vector<8x8xbf16> to vector<8x8xf32>
    %c0_5 = arith.constant 0 : index
    %c0_6 = arith.constant 0 : index
    %5 = vector.load %arg9[%c0_5, %c0_6] : memref<4x32xf32, #tpu.memory_space<vmem>>, vector<1x32xf32>
    %6 = vector.shape_cast %5 : vector<1x32xf32> to vector<32xf32>
    %c1 = arith.constant 1 : index
    %c0_7 = arith.constant 0 : index
    %7 = vector.load %arg9[%c1, %c0_7] : memref<4x32xf32, #tpu.memory_space<vmem>>, vector<1x32xf32>
    %8 = vector.shape_cast %7 : vector<1x32xf32> to vector<32xf32>
    %c2 = arith.constant 2 : index
    %c0_8 = arith.constant 0 : index
    %9 = vector.load %arg9[%c2, %c0_8] : memref<4x32xf32, #tpu.memory_space<vmem>>, vector<1x32xf32>
    %10 = vector.shape_cast %9 : vector<1x32xf32> to vector<32xf32>
    %c3 = arith.constant 3 : index
    %c0_9 = arith.constant 0 : index
    %11 = vector.load %arg9[%c3, %c0_9] : memref<4x32xf32, #tpu.memory_space<vmem>>, vector<1x32xf32>
    %12 = vector.shape_cast %11 : vector<1x32xf32> to vector<32xf32>
    %c0_10 = arith.constant 0 : index
    %c0_11 = arith.constant 0 : index
    %c0_12 = arith.constant 0 : index
    %c0_13 = arith.constant 0 : index
    %13 = vector.load %arg10[%c0_10, %c0_11, %c0_12, %c0_13] : memref<2x4x1x8xf32, #tpu.memory_space<vmem>>, vector<1x4x1x8xf32>
    %14 = vector.shape_cast %13 : vector<1x4x1x8xf32> to vector<4x1x8xf32>
    %c1_14 = arith.constant 1 : index
    %c0_15 = arith.constant 0 : index
    %c0_16 = arith.constant 0 : index
    %c0_17 = arith.constant 0 : index
    %15 = vector.load %arg10[%c1_14, %c0_15, %c0_16, %c0_17] : memref<2x4x1x8xf32, #tpu.memory_space<vmem>>, vector<1x4x1x8xf32>
    %16 = vector.shape_cast %15 : vector<1x4x1x8xf32> to vector<4x1x8xf32>
    %c0_18 = arith.constant 0 : index
    %c0_19 = arith.constant 0 : index
    %17 = vector.load %arg11[%c0_18, %c0_19] : memref<2x64xf32, #tpu.memory_space<vmem>>, vector<1x64xf32>
    %18 = vector.shape_cast %17 : vector<1x64xf32> to vector<64xf32>
    %c1_20 = arith.constant 1 : index
    %c0_21 = arith.constant 0 : index
    %19 = vector.load %arg11[%c1_20, %c0_21] : memref<2x64xf32, #tpu.memory_space<vmem>>, vector<1x64xf32>
    %20 = vector.shape_cast %19 : vector<1x64xf32> to vector<64xf32>
    %cst = arith.constant dense<0.000000e+00> : vector<8xf32>
    %21 = vector.multi_reduction <add>, %1, %cst [1] : vector<8x32xf32> to vector<8xf32>
    %22 = vector.shape_cast %21 : vector<8xf32> to vector<8x1xf32>
    %cst_22 = arith.constant 3.200000e+01 : f32
    %23 = vector.broadcast %cst_22 : f32 to vector<8x1xf32>
    %24 = arith.divf %22, %23 : vector<8x1xf32>
    %25 = vector.broadcast %24 : vector<8x1xf32> to vector<8x32xf32>
    %26 = arith.subf %1, %25 : vector<8x32xf32>
    %27 = vector.broadcast %24 : vector<8x1xf32> to vector<8x32xf32>
    %28 = arith.subf %1, %27 : vector<8x32xf32>
    %29 = arith.mulf %26, %28 : vector<8x32xf32>
    %cst_23 = arith.constant dense<0.000000e+00> : vector<8xf32>
    %30 = vector.multi_reduction <add>, %29, %cst_23 [1] : vector<8x32xf32> to vector<8xf32>
    %31 = vector.shape_cast %30 : vector<8xf32> to vector<8x1xf32>
    %cst_24 = arith.constant 3.200000e+01 : f32
    %32 = vector.broadcast %cst_24 : f32 to vector<8x1xf32>
    %33 = arith.divf %31, %32 : vector<8x1xf32>
    %34 = vector.broadcast %24 : vector<8x1xf32> to vector<8x32xf32>
    %35 = arith.subf %1, %34 : vector<8x32xf32>
    %cst_25 = arith.constant 9.99999974E-6 : f32
    %36 = vector.broadcast %cst_25 : f32 to vector<8x1xf32>
    %37 = arith.addf %33, %36 : vector<8x1xf32>
    %38 = math.rsqrt %37 : vector<8x1xf32>
    %39 = vector.broadcast %38 : vector<8x1xf32> to vector<8x32xf32>
    %40 = arith.mulf %35, %39 : vector<8x32xf32>
    %41 = vector.shape_cast %6 : vector<32xf32> to vector<1x32xf32>
    %42 = vector.broadcast %41 : vector<1x32xf32> to vector<8x32xf32>
    %43 = arith.mulf %40, %42 : vector<8x32xf32>
    %44 = vector.shape_cast %8 : vector<32xf32> to vector<1x32xf32>
    %45 = vector.broadcast %44 : vector<1x32xf32> to vector<8x32xf32>
    %46 = arith.addf %43, %45 : vector<8x32xf32>
    %47 = arith.truncf %46 : vector<8x32xf32> to vector<8x32xbf16>
    %c0_26 = arith.constant 0 : index
    %c0_27 = arith.constant 0 : index
    %48 = vector.load %arg3[%c0_26, %c0_27] : memref<32x96xbf16, #tpu.memory_space<vmem>>, vector<32x96xbf16>
    %cst_28 = arith.constant dense<0.000000e+00> : vector<8x96xf32>
    %49 = tpu.matmul %47, %48, %cst_28 {dimension_numbers = #tpu.dot_dimension_numbers<[1], [0], [0], [1], [0, 0, 1, 1], [], []>} : vector<8x32xbf16>, vector<32x96xbf16>, vector<8x96xf32> -> vector<8x96xf32>
    %50 = vector.extract_strided_slice %49 {offsets = [0, 0], sizes = [8, 8], strides = [1, 1]} : vector<8x96xf32> to vector<8x8xf32>
    %51 = vector.extract_strided_slice %49 {offsets = [0, 8], sizes = [8, 8], strides = [1, 1]} : vector<8x96xf32> to vector<8x8xf32>
    %52 = vector.extract_strided_slice %49 {offsets = [0, 16], sizes = [8, 8], strides = [1, 1]} : vector<8x96xf32> to vector<8x8xf32>
    %53 = vector.extract_strided_slice %49 {offsets = [0, 24], sizes = [8, 8], strides = [1, 1]} : vector<8x96xf32> to vector<8x8xf32>
    %54 = vector.shape_cast %50 : vector<8x8xf32> to vector<1x8x8xf32>
    %55 = vector.shape_cast %51 : vector<8x8xf32> to vector<1x8x8xf32>
    %56 = vector.shape_cast %52 : vector<8x8xf32> to vector<1x8x8xf32>
    %57 = vector.shape_cast %53 : vector<8x8xf32> to vector<1x8x8xf32>
    %58 = tpu.concatenate %54, %55, %56, %57 in 0 : vector<1x8x8xf32>, vector<1x8x8xf32>, vector<1x8x8xf32>, vector<1x8x8xf32> -> vector<4x8x8xf32>
    %59 = vector.extract_strided_slice %49 {offsets = [0, 32], sizes = [8, 8], strides = [1, 1]} : vector<8x96xf32> to vector<8x8xf32>
    %60 = vector.extract_strided_slice %49 {offsets = [0, 40], sizes = [8, 8], strides = [1, 1]} : vector<8x96xf32> to vector<8x8xf32>
    %61 = vector.extract_strided_slice %49 {offsets = [0, 48], sizes = [8, 8], strides = [1, 1]} : vector<8x96xf32> to vector<8x8xf32>
    %62 = vector.extract_strided_slice %49 {offsets = [0, 56], sizes = [8, 8], strides = [1, 1]} : vector<8x96xf32> to vector<8x8xf32>
    %63 = vector.shape_cast %59 : vector<8x8xf32> to vector<1x8x8xf32>
    %64 = vector.shape_cast %60 : vector<8x8xf32> to vector<1x8x8xf32>
    %65 = vector.shape_cast %61 : vector<8x8xf32> to vector<1x8x8xf32>
    %66 = vector.shape_cast %62 : vector<8x8xf32> to vector<1x8x8xf32>
    %67 = tpu.concatenate %63, %64, %65, %66 in 0 : vector<1x8x8xf32>, vector<1x8x8xf32>, vector<1x8x8xf32>, vector<1x8x8xf32> -> vector<4x8x8xf32>
    %68 = vector.extract_strided_slice %49 {offsets = [0, 64], sizes = [8, 8], strides = [1, 1]} : vector<8x96xf32> to vector<8x8xf32>
    %69 = vector.extract_strided_slice %49 {offsets = [0, 72], sizes = [8, 8], strides = [1, 1]} : vector<8x96xf32> to vector<8x8xf32>
    %70 = vector.extract_strided_slice %49 {offsets = [0, 80], sizes = [8, 8], strides = [1, 1]} : vector<8x96xf32> to vector<8x8xf32>
    %71 = vector.extract_strided_slice %49 {offsets = [0, 88], sizes = [8, 8], strides = [1, 1]} : vector<8x96xf32> to vector<8x8xf32>
    %72 = vector.shape_cast %68 : vector<8x8xf32> to vector<1x8x8xf32>
    %73 = vector.shape_cast %69 : vector<8x8xf32> to vector<1x8x8xf32>
    %74 = vector.shape_cast %70 : vector<8x8xf32> to vector<1x8x8xf32>
    %75 = vector.shape_cast %71 : vector<8x8xf32> to vector<1x8x8xf32>
    %76 = tpu.concatenate %72, %73, %74, %75 in 0 : vector<1x8x8xf32>, vector<1x8x8xf32>, vector<1x8x8xf32>, vector<1x8x8xf32> -> vector<4x8x8xf32>
    %77 = arith.truncf %58 : vector<4x8x8xf32> to vector<4x8x8xbf16>
    %78 = arith.truncf %67 : vector<4x8x8xf32> to vector<4x8x8xbf16>
    "tpu.trace_start"() <{level = 10 : i32, message = "hnd,hsd->hns"}> : () -> ()
    %cst_29 = arith.constant dense<0.000000e+00> : vector<4x8x8xf32>
    %79 = tpu.matmul %77, %78, %cst_29 {dimension_numbers = #tpu.dot_dimension_numbers<[2], [2], [1], [1], [0, 0, 0, 1, 1, 1], [0], [0]>} : vector<4x8x8xbf16>, vector<4x8x8xbf16>, vector<4x8x8xf32> -> vector<4x8x8xf32>
    "tpu.trace_stop"() : () -> ()
    %80 = vector.shape_cast %4 : vector<8x8xf32> to vector<1x8x8xf32>
    %81 = vector.broadcast %80 : vector<1x8x8xf32> to vector<4x8x8xf32>
    %82 = arith.addf %79, %81 : vector<4x8x8xf32>
    %cst_30 = arith.constant dense<0xFF800000> : vector<4x8xf32>
    %83 = vector.multi_reduction <maximumf>, %82, %cst_30 [2] : vector<4x8x8xf32> to vector<4x8xf32>
    %84 = vector.shape_cast %83 : vector<4x8xf32> to vector<4x8x1xf32>
    %85 = vector.broadcast %84 : vector<4x8x1xf32> to vector<4x8x8xf32>
    %86 = arith.subf %82, %85 : vector<4x8x8xf32>
    %87 = math.exp %86 : vector<4x8x8xf32>
    %cst_31 = arith.constant dense<0.000000e+00> : vector<4x8xf32>
    %88 = vector.multi_reduction <add>, %87, %cst_31 [2] : vector<4x8x8xf32> to vector<4x8xf32>
    %89 = vector.shape_cast %88 : vector<4x8xf32> to vector<4x8x1xf32>
    %90 = tpu.reciprocal %89 {approx = true} : vector<4x8x1xf32> -> vector<4x8x1xf32>
    %91 = vector.broadcast %90 : vector<4x8x1xf32> to vector<4x8x8xf32>
    %92 = arith.mulf %87, %91 : vector<4x8x8xf32>
    %cst_32 = arith.constant 0.353553385 : f32
    %93 = vector.broadcast %cst_32 : f32 to vector<4x8x8xf32>
    %94 = arith.mulf %76, %93 : vector<4x8x8xf32>
    %95 = arith.truncf %92 : vector<4x8x8xf32> to vector<4x8x8xbf16>
    %96 = arith.truncf %94 : vector<4x8x8xf32> to vector<4x8x8xbf16>
    "tpu.trace_start"() <{level = 10 : i32, message = "hns,hsd->hnd"}> : () -> ()
    %cst_33 = arith.constant dense<0.000000e+00> : vector<4x8x8xf32>
    %97 = tpu.matmul %95, %96, %cst_33 {dimension_numbers = #tpu.dot_dimension_numbers<[2], [1], [1], [2], [0, 0, 0, 1, 1, 2], [0], [0]>} : vector<4x8x8xbf16>, vector<4x8x8xbf16>, vector<4x8x8xf32> -> vector<4x8x8xf32>
    "tpu.trace_stop"() : () -> ()
    %cst_34 = arith.constant dense<0.000000e+00> : vector<4x8xf32>
    %98 = vector.multi_reduction <add>, %97, %cst_34 [2] : vector<4x8x8xf32> to vector<4x8xf32>
    %99 = vector.shape_cast %98 : vector<4x8xf32> to vector<4x8x1xf32>
    %cst_35 = arith.constant dense<0.000000e+00> : vector<8x1xf32>
    %100 = vector.multi_reduction <add>, %99, %cst_35 [0] : vector<4x8x1xf32> to vector<8x1xf32>
    %101 = vector.shape_cast %100 : vector<8x1xf32> to vector<1x8x1xf32>
    %cst_36 = arith.constant 3.200000e+01 : f32
    %102 = vector.broadcast %cst_36 : f32 to vector<1x8x1xf32>
    %103 = arith.divf %101, %102 : vector<1x8x1xf32>
    %104 = vector.broadcast %103 : vector<1x8x1xf32> to vector<4x8x8xf32>
    %105 = arith.subf %97, %104 : vector<4x8x8xf32>
    %106 = arith.mulf %105, %105 : vector<4x8x8xf32>
    %cst_37 = arith.constant dense<0.000000e+00> : vector<4x8xf32>
    %107 = vector.multi_reduction <add>, %106, %cst_37 [2] : vector<4x8x8xf32> to vector<4x8xf32>
    %108 = vector.shape_cast %107 : vector<4x8xf32> to vector<4x8x1xf32>
    %cst_38 = arith.constant dense<0.000000e+00> : vector<8x1xf32>
    %109 = vector.multi_reduction <add>, %108, %cst_38 [0] : vector<4x8x1xf32> to vector<8x1xf32>
    %110 = vector.shape_cast %109 : vector<8x1xf32> to vector<1x8x1xf32>
    %cst_39 = arith.constant 3.200000e+01 : f32
    %111 = vector.broadcast %cst_39 : f32 to vector<1x8x1xf32>
    %112 = arith.divf %110, %111 : vector<1x8x1xf32>
    %cst_40 = arith.constant 9.99999974E-6 : f32
    %113 = vector.broadcast %cst_40 : f32 to vector<1x8x1xf32>
    %114 = arith.addf %112, %113 : vector<1x8x1xf32>
    %115 = math.rsqrt %114 : vector<1x8x1xf32>
    %116 = vector.broadcast %115 : vector<1x8x1xf32> to vector<4x8x8xf32>
    %117 = arith.mulf %105, %116 : vector<4x8x8xf32>
    %118 = vector.broadcast %14 : vector<4x1x8xf32> to vector<4x8x8xf32>
    %119 = arith.mulf %117, %118 : vector<4x8x8xf32>
    %120 = vector.broadcast %16 : vector<4x1x8xf32> to vector<4x8x8xf32>
    %121 = arith.addf %119, %120 : vector<4x8x8xf32>
    %122 = arith.truncf %121 : vector<4x8x8xf32> to vector<4x8x8xbf16>
    %c0_41 = arith.constant 0 : index
    %c0_42 = arith.constant 0 : index
    %c0_43 = arith.constant 0 : index
    %123 = vector.load %arg4[%c0_41, %c0_42, %c0_43] : memref<4x8x32xbf16, #tpu.memory_space<vmem>>, vector<4x8x32xbf16>
    "tpu.trace_start"() <{level = 10 : i32, message = "hnd,hde->hne"}> : () -> ()
    %cst_44 = arith.constant dense<0.000000e+00> : vector<4x8x32xf32>
    %124 = tpu.matmul %122, %123, %cst_44 {dimension_numbers = #tpu.dot_dimension_numbers<[2], [1], [1], [2], [0, 0, 0, 1, 1, 2], [0], [0]>} : vector<4x8x8xbf16>, vector<4x8x32xbf16>, vector<4x8x32xf32> -> vector<4x8x32xf32>
    "tpu.trace_stop"() : () -> ()
    %cst_45 = arith.constant dense<0.000000e+00> : vector<8x32xf32>
    %125 = vector.multi_reduction <add>, %124, %cst_45 [0] : vector<4x8x32xf32> to vector<8x32xf32>
    %126 = arith.addf %1, %125 : vector<8x32xf32>
    %cst_46 = arith.constant dense<0.000000e+00> : vector<8xf32>
    %127 = vector.multi_reduction <add>, %126, %cst_46 [1] : vector<8x32xf32> to vector<8xf32>
    %128 = vector.shape_cast %127 : vector<8xf32> to vector<8x1xf32>
    %cst_47 = arith.constant 3.200000e+01 : f32
    %129 = vector.broadcast %cst_47 : f32 to vector<8x1xf32>
    %130 = arith.divf %128, %129 : vector<8x1xf32>
    %131 = vector.broadcast %130 : vector<8x1xf32> to vector<8x32xf32>
    %132 = arith.subf %126, %131 : vector<8x32xf32>
    %133 = vector.broadcast %130 : vector<8x1xf32> to vector<8x32xf32>
    %134 = arith.subf %126, %133 : vector<8x32xf32>
    %135 = arith.mulf %132, %134 : vector<8x32xf32>
    %cst_48 = arith.constant dense<0.000000e+00> : vector<8xf32>
    %136 = vector.multi_reduction <add>, %135, %cst_48 [1] : vector<8x32xf32> to vector<8xf32>
    %137 = vector.shape_cast %136 : vector<8xf32> to vector<8x1xf32>
    %cst_49 = arith.constant 3.200000e+01 : f32
    %138 = vector.broadcast %cst_49 : f32 to vector<8x1xf32>
    %139 = arith.divf %137, %138 : vector<8x1xf32>
    %140 = vector.broadcast %130 : vector<8x1xf32> to vector<8x32xf32>
    %141 = arith.subf %126, %140 : vector<8x32xf32>
    %cst_50 = arith.constant 9.99999974E-6 : f32
    %142 = vector.broadcast %cst_50 : f32 to vector<8x1xf32>
    %143 = arith.addf %139, %142 : vector<8x1xf32>
    %144 = math.rsqrt %143 : vector<8x1xf32>
    %145 = vector.broadcast %144 : vector<8x1xf32> to vector<8x32xf32>
    %146 = arith.mulf %141, %145 : vector<8x32xf32>
    %147 = vector.shape_cast %10 : vector<32xf32> to vector<1x32xf32>
    %148 = vector.broadcast %147 : vector<1x32xf32> to vector<8x32xf32>
    %149 = arith.mulf %146, %148 : vector<8x32xf32>
    %150 = vector.shape_cast %12 : vector<32xf32> to vector<1x32xf32>
    %151 = vector.broadcast %150 : vector<1x32xf32> to vector<8x32xf32>
    %152 = arith.addf %149, %151 : vector<8x32xf32>
    %153 = arith.truncf %152 : vector<8x32xf32> to vector<8x32xbf16>
    %c0_51 = arith.constant 0 : index
    %c0_52 = arith.constant 0 : index
    %154 = vector.load %arg5[%c0_51, %c0_52] : memref<32x64xbf16, #tpu.memory_space<vmem>>, vector<32x64xbf16>
    %cst_53 = arith.constant dense<0.000000e+00> : vector<8x64xf32>
    %155 = tpu.matmul %153, %154, %cst_53 {dimension_numbers = #tpu.dot_dimension_numbers<[1], [0], [0], [1], [0, 0, 1, 1], [], []>} : vector<8x32xbf16>, vector<32x64xbf16>, vector<8x64xf32> -> vector<8x64xf32>
    %c0_54 = arith.constant 0 : index
    %c0_55 = arith.constant 0 : index
    %156 = vector.load %arg6[%c0_54, %c0_55] : memref<1x64xf32, #tpu.memory_space<vmem>>, vector<1x64xf32>
    %157 = vector.shape_cast %156 : vector<1x64xf32> to vector<64xf32>
    %158 = vector.shape_cast %157 : vector<64xf32> to vector<1x64xf32>
    %159 = vector.broadcast %158 : vector<1x64xf32> to vector<8x64xf32>
    %160 = arith.addf %155, %159 : vector<8x64xf32>
    %161 = arith.negf %160 : vector<8x64xf32>
    %162 = math.exp %161 : vector<8x64xf32>
    %cst_56 = arith.constant 1.000000e+00 : f32
    %163 = vector.broadcast %cst_56 : f32 to vector<8x64xf32>
    %164 = arith.addf %163, %162 : vector<8x64xf32>
    %165 = arith.divf %163, %164 : vector<8x64xf32>
    %166 = arith.mulf %160, %165 : vector<8x64xf32>
    %cst_57 = arith.constant dense<0.000000e+00> : vector<8xf32>
    %167 = vector.multi_reduction <add>, %166, %cst_57 [1] : vector<8x64xf32> to vector<8xf32>
    %168 = vector.shape_cast %167 : vector<8xf32> to vector<8x1xf32>
    %cst_58 = arith.constant 6.400000e+01 : f32
    %169 = vector.broadcast %cst_58 : f32 to vector<8x1xf32>
    %170 = arith.divf %168, %169 : vector<8x1xf32>
    %171 = vector.broadcast %170 : vector<8x1xf32> to vector<8x64xf32>
    %172 = arith.subf %166, %171 : vector<8x64xf32>
    %173 = vector.broadcast %170 : vector<8x1xf32> to vector<8x64xf32>
    %174 = arith.subf %166, %173 : vector<8x64xf32>
    %175 = arith.mulf %172, %174 : vector<8x64xf32>
    %cst_59 = arith.constant dense<0.000000e+00> : vector<8xf32>
    %176 = vector.multi_reduction <add>, %175, %cst_59 [1] : vector<8x64xf32> to vector<8xf32>
    %177 = vector.shape_cast %176 : vector<8xf32> to vector<8x1xf32>
    %cst_60 = arith.constant 6.400000e+01 : f32
    %178 = vector.broadcast %cst_60 : f32 to vector<8x1xf32>
    %179 = arith.divf %177, %178 : vector<8x1xf32>
    %180 = vector.broadcast %170 : vector<8x1xf32> to vector<8x64xf32>
    %181 = arith.subf %166, %180 : vector<8x64xf32>
    %cst_61 = arith.constant 9.99999974E-6 : f32
    %182 = vector.broadcast %cst_61 : f32 to vector<8x1xf32>
    %183 = arith.addf %179, %182 : vector<8x1xf32>
    %184 = math.rsqrt %183 : vector<8x1xf32>
    %185 = vector.broadcast %184 : vector<8x1xf32> to vector<8x64xf32>
    %186 = arith.mulf %181, %185 : vector<8x64xf32>
    %187 = vector.shape_cast %18 : vector<64xf32> to vector<1x64xf32>
    %188 = vector.broadcast %187 : vector<1x64xf32> to vector<8x64xf32>
    %189 = arith.mulf %186, %188 : vector<8x64xf32>
    %190 = vector.shape_cast %20 : vector<64xf32> to vector<1x64xf32>
    %191 = vector.broadcast %190 : vector<1x64xf32> to vector<8x64xf32>
    %192 = arith.addf %189, %191 : vector<8x64xf32>
    %193 = arith.truncf %192 : vector<8x64xf32> to vector<8x64xbf16>
    %c0_62 = arith.constant 0 : index
    %c0_63 = arith.constant 0 : index
    %194 = vector.load %arg7[%c0_62, %c0_63] : memref<64x32xbf16, #tpu.memory_space<vmem>>, vector<64x32xbf16>
    %cst_64 = arith.constant dense<0.000000e+00> : vector<8x32xf32>
    %195 = tpu.matmul %193, %194, %cst_64 {dimension_numbers = #tpu.dot_dimension_numbers<[1], [0], [0], [1], [0, 0, 1, 1], [], []>} : vector<8x64xbf16>, vector<64x32xbf16>, vector<8x32xf32> -> vector<8x32xf32>
    %c0_65 = arith.constant 0 : index
    %c0_66 = arith.constant 0 : index
    %196 = vector.load %arg8[%c0_65, %c0_66] : memref<1x32xf32, #tpu.memory_space<vmem>>, vector<1x32xf32>
    %197 = vector.shape_cast %196 : vector<1x32xf32> to vector<32xf32>
    %198 = vector.shape_cast %197 : vector<32xf32> to vector<1x32xf32>
    %199 = vector.broadcast %198 : vector<1x32xf32> to vector<8x32xf32>
    %200 = arith.addf %195, %199 : vector<8x32xf32>
    %201 = arith.addf %126, %200 : vector<8x32xf32>
    %202 = arith.addf %201, %152 : vector<8x32xf32>
    %c0_67 = arith.constant 0 : index
    %c0_68 = arith.constant 0 : index
    %c0_69 = arith.constant 0 : index
    %203 = vector.load %arg12[%c0_67, %c0_68, %c0_69] : memref<1x8x32xf32, #tpu.memory_space<vmem>>, vector<1x8x32xf32>
    %204 = vector.shape_cast %203 : vector<1x8x32xf32> to vector<8x32xf32>
    %205 = vector.shape_cast %202 : vector<8x32xf32> to vector<1x8x32xf32>
    tpu.vector_store %arg12[%c0_67, %c0_68, %c0_69], %205 {strides = array<i32>} : memref<1x8x32xf32, #tpu.memory_space<vmem>>, vector<1x8x32xf32>,
    return
  }
  func.func @transform_0(%arg0: i32) -> (i32, i32, i32) {
    %c0_i32 = arith.constant 0 : i32
    %c0_i32_0 = arith.constant 0 : i32
    %c0_i32_1 = arith.constant 0 : i32
    return %arg0, %c0_i32, %c0_i32_0 : i32, i32, i32
  }
  func.func @transform_1(%arg0: i32) -> (i32, i32, i32) {
    %c0_i32 = arith.constant 0 : i32
    %c0_i32_0 = arith.constant 0 : i32
    %c0_i32_1 = arith.constant 0 : i32
    return %arg0, %c0_i32, %c0_i32_0 : i32, i32, i32
  }
  func.func @transform_2(%arg0: i32) -> (i32, i32) {
    %c0_i32 = arith.constant 0 : i32
    %c0_i32_0 = arith.constant 0 : i32
    %c0_i32_1 = arith.constant 0 : i32
    return %c0_i32, %c0_i32_0 : i32, i32
  }
  func.func @transform_3(%arg0: i32) -> (i32, i32, i32) {
    %c0_i32 = arith.constant 0 : i32
    %c0_i32_0 = arith.constant 0 : i32
    %c0_i32_1 = arith.constant 0 : i32
    %c0_i32_2 = arith.constant 0 : i32
    return %c0_i32, %c0_i32_0, %c0_i32_1 : i32, i32, i32
  }
  func.func @transform_4(%arg0: i32) -> (i32, i32) {
    %c0_i32 = arith.constant 0 : i32
    %c0_i32_0 = arith.constant 0 : i32
    %c0_i32_1 = arith.constant 0 : i32
    return %c0_i32, %c0_i32_0 : i32, i32
  }
  func.func @transform_5(%arg0: i32) -> (i32, i32) {
    %c0_i32 = arith.constant 0 : i32
    %c0_i32_0 = arith.constant 0 : i32
    %c0_i32_1 = arith.constant 0 : i32
    return %c0_i32, %c0_i32_0 : i32, i32
  }
  func.func @transform_6(%arg0: i32) -> (i32, i32) {
    %c0_i32 = arith.constant 0 : i32
    %c0_i32_0 = arith.constant 0 : i32
    %c0_i32_1 = arith.constant 0 : i32
    return %c0_i32, %c0_i32_0 : i32, i32
  }
  func.func @transform_7(%arg0: i32) -> (i32, i32) {
    %c0_i32 = arith.constant 0 : i32
    %c0_i32_0 = arith.constant 0 : i32
    %c0_i32_1 = arith.constant 0 : i32
    return %c0_i32, %c0_i32_0 : i32, i32
  }
  func.func @transform_8(%arg0: i32) -> (i32, i32) {
    %c0_i32 = arith.constant 0 : i32
    %c0_i32_0 = arith.constant 0 : i32
    %c0_i32_1 = arith.constant 0 : i32
    return %c0_i32, %c0_i32_0 : i32, i32
  }
  func.func @transform_9(%arg0: i32) -> (i32, i32, i32, i32) {
    %c0_i32 = arith.constant 0 : i32
    %c0_i32_0 = arith.constant 0 : i32
    %c0_i32_1 = arith.constant 0 : i32
    %c0_i32_2 = arith.constant 0 : i32
    %c0_i32_3 = arith.constant 0 : i32
    return %c0_i32, %c0_i32_0, %c0_i32_1, %c0_i32_2 : i32, i32, i32, i32
  }
  func.func @transform_10(%arg0: i32) -> (i32, i32) {
    %c0_i32 = arith.constant 0 : i32
    %c0_i32_0 = arith.constant 0 : i32
    %c0_i32_1 = arith.constant 0 : i32
    return %c0_i32, %c0_i32_0 : i32, i32
  }
  func.func @transform_11(%arg0: i32) -> (i32, i32, i32) {
    %c0_i32 = arith.constant 0 : i32
    %c0_i32_0 = arith.constant 0 : i32
    %c0_i32_1 = arith.constant 0 : i32
    return %arg0, %c0_i32, %c0_i32_0 : i32, i32, i32
  }
}

</mosaic_0001>

<bundles_post_ra>
// kernel: tpu_custom_call.1
= control target key start
LH: loop header
LB: loop body
LE: loop exit
PB: predicated region body
PF: predicated region fallthrough
CT: control target
= control target key end

     0   :  { %s2641_s0 = inlined_call_operand.vmem [shape: f32[2,8,32], index: 0, kind: input, shape index: {}]   ;;  %s2642_s1 = inlined_call_operand.hbm [shape: bf16[2,8,8], index: 1, kind: input, shape index: {}]   ;;  %s2643_s2 = inlined_call_operand.vmem [shape: bf16[32,96], index: 2, kind: input, shape index: {}]   ;;  %s2644_s3 = inlined_call_operand.vmem [shape: bf16[4,8,32], index: 3, kind: input, shape index: {}]   ;;  %s2645_s4 = inlined_call_operand.hbm [shape: bf16[32,64], index: 4, kind: input, shape index: {}]   ;;  %s2646_s5 = inlined_call_operand.hbm [shape: f32[1,64], index: 5, kind: input, shape index: {}]   ;;  %s2647_s6 = inlined_call_operand.vmem [shape: bf16[64,32], index: 6, kind: input, shape index: {}]   ;;  %s2648_s7 = inlined_call_operand.hbm [shape: f32[1,32], index: 7, kind: input, shape index: {}]   ;;  %s2649_s8 = inlined_call_operand.vmem [shape: f32[4,32], index: 8, kind: input, shape index: {}]   ;;  %s2650_s9 = inlined_call_operand.vmem [shape: f32[2,4,1,8], index: 9, kind: input, shape index: {}]   ;;  %s2651_s10 = inlined_call_operand.vmem [shape: f32[2,64], index: 10, kind: input, shape index: {}]   ;;  %s2652_s11 = inlined_call_operand.hbm [shape: f32[2,8,32], index: 11, kind: output, shape index: {}]  }
   0x1   :  { %2659 = sst [smem:[#allocation18_spill]] %s2645_s4 }
   0x2   :  { %2660 = sst [smem:[#allocation19_spill]] %s2646_s5 }
   0x3   :  { %2661 = sst [smem:[#allocation20_spill]] %s2648_s7 }
   0x4   :  { %16 = vsyncpa [#allocation3], 0 }
   0x5   :  { %18 = vsyncpa [#allocation3 + $0x1], 0 }
   0x6   :  { %19 = vsyncpa [#allocation6], 0 }
   0x7   :  { %20 = vsyncpa [#allocation9], 0 }
   0x8   :  { %21 = vsyncpa [#allocation4], 0 }
   0x9   :  { %23 = vsyncpa [#allocation4 + $0x1], 0  ;;  %s2236_s17 = smov 0   ;;  %s2238_s18 = smov 0  }
   0xa   :  { %s2240_s19 = smov 0   ;;  %s2242_s20 = smov 0  }
   0xb LB: > { %2662 = sst [smem:[#allocation15_spill]] %s2156_s19  ;;  %s2257_s21 = sadd.s32 4294967295, %s2160_s20   ;;  %s2160_s20 = sphi %s2242_s20, %s2689_s20   ;;  %s2156_s19 = sphi %s2240_s19, %s2686_s19   ;;  %s2152_s18 = sphi %s2238_s18, %s2688_s18   ;;  %s2148_s17 = sphi %s2236_s17, %s2687_s17  }
   0xc   : > { %s1662_s22 = sadd.s32 4294967294, %s2160_s20   ;;  %p75_p0 = scmp.ne.s32.totalorder %s2152_s18, %s2148_s17 }
   0xd   : > { %p2653_p1 = scmp.eq.s32.totalorder %s2257_s21, 0  ;;  %p294_p3 = scmp.eq.s32.totalorder %s1662_s22, 1 }
   0xe   : > { %p1663_p5 = scmp.ge.s32.totalorder %s2160_s20, 1  ;;  %p301_p7 = scmp.lt.s32.totalorder %s2160_s20, 3 }
   0xf   : > { %p2266_p4 = por %p2653_p1, %p75_p0  ;;  %p2271_p6 = por %p294_p3, %p75_p0 }
  0x10   : > { %p2276_p8 = pnand %p1663_p5, %p301_p7  ;;  %s2162_s26 = smov [#allocation5]  }
  0x11   : > { %s2663_s23 = scalar_select %p2266_p4, 1, 0 }
  0x12   : > { %s2664_s24 = scalar_select %p2271_p6, 1, 0 }
  0x13   : > { %s2666_s25 = scalar_select %p2276_p8, 1, 0 }
  0x14   : > { %2665 = sst [smem:[#allocation16_spill]] %s2664_s24  ;;  %s319_s27 = sshll.u32 %s2162_s26, 4  ;;  %s320_s27 = int_to_ptr.vmem [resolvable:$true] %s319_s27 }
  0x15   : > { %p1876_p9 = pneg %p2276_p8  ;;  %s2163_s29 = smov [#allocation7]  }
  0x16   : > { %s333_s30 = sshll.u32 %s2163_s29, 4  ;;  %s2164_s12 = smov [#allocation8]   ;;  %s334_s30 = int_to_ptr.vmem [resolvable:$true] %s333_s30 }
  0x17   : > { %p2285_p11 = pnand %p1876_p9, %p2653_p1  ;;  %s347_s13 = sshll.u32 %s2164_s12, 4  ;;  %s348_s13 = int_to_ptr.vmem [resolvable:$true] %s347_s13 }
  0x18   : > { %s1993_s14 = scalar_lea.vmem %s320_s27, 256  ;;  %p2001_p5 = scmp.lt.s32.totalorder %s320_s27, %s320_s27 }
  0x19   : > { %p1984_p12 = pneg %p2285_p11  ;;  %p1994_p13 = scmp.ne.s32.totalorder %s320_s27, %s1993_s14 }
  0x1a   : > { %p2002_p7 = scmp.lt.s32.totalorder %s1993_s14, %s1993_s14 }
  0x1b   : > { %p1996_p0 = pnand %p1994_p13, %p1984_p12 }
  0x1c   : > { %p2003_p9 = por %p2002_p7, %p2001_p5 }
  0x1d   : > { %p1997_p3 = pneg %p1996_p0 }
  0x1f   : > { %p2004_p10 = pnand %p2003_p9, %p1997_p3 }
  0x21   : > { %2007 = shalt.err (!%p2004_p10)
}
  0x22   : > { %s2165_s15 = smov 64   ;;  %s2166_s16 = smov 4  }
  0x23   : > { %s2668_s4 = sld [smem:[#allocation18_spill]]  ;;  %s2019_s29 = scalar_lea.vmem %s334_s30, 16 }
  0x24   : > { %p2020_p1 = scmp.ne.s32.totalorder %s334_s30, %s2019_s29  ;;  %s2026_s12 = scalar_lea.vmem %s334_s30, 32 }
  0x25   : > { %p2027_p2 = scmp.lt.s32.totalorder %s334_s30, %s334_s30  ;;  %p2028_p5 = scmp.lt.s32.totalorder %s2026_s12, %s2019_s29 }
  0x26   : > { %p2022_p13 = pnand %p2020_p1, %p1984_p12 }
  0x27   : > { %p2029_p3 = por %p2028_p5, %p2027_p2 }
  0x28   : > { %p2023_p0 = pneg %p2022_p13 }
  0x29   : > { %1879 = dma.hbm_to_vmem [thread:$0]  (!%p2285_p11), %s2668_s4, 256, %s320_s27, [#allocation6], %s2165_s15, %s2165_s15, %s2166_s16  }
  0x2a   : > { %p2030_p10 = pnand %p2029_p3, %p2023_p0 }
  0x2c   : > { %2033 = shalt.err (!%p2030_p10)
}
  0x2d   : > { %s2669_s5 = sld [smem:[#allocation19_spill]]  ;;  %s2045_s27 = scalar_lea.vmem %s348_s13, 16 }
  0x2e   : > { %p2046_p7 = scmp.ne.s32.totalorder %s348_s13, %s2045_s27  ;;  %s2052_s15 = scalar_lea.vmem %s348_s13, 32 }
  0x2f   : > { %p2053_p13 = scmp.lt.s32.totalorder %s348_s13, %s348_s13  ;;  %p2054_p6 = scmp.lt.s32.totalorder %s2052_s15, %s2045_s27 }
  0x30   : > { %p2048_p1 = pnand %p2046_p7, %p1984_p12 }
  0x31   : > { %p2055_p2 = por %p2054_p6, %p2053_p13 }
  0x32   : > { %p2049_p9 = pneg %p2048_p1 }
  0x33   : > { %1882 = dma.hbm_to_vmem [thread:$0]  (!%p2285_p11), %s2669_s5, 16, %s334_s30, [#allocation6]  }
  0x34   : > { %p2056_p0 = pnand %p2055_p2, %p2049_p9 }
  0x36   : > { %2059 = shalt.err (!%p2056_p0)
}
  0x37   : > { %s2670_s7 = sld [smem:[#allocation20_spill]]  ;;  %s2316_s24 = sadd.s32 1, %s2160_s20  }
  0x38   : > { %s59_s30 = ssub.s32 %s2160_s20, %s2316_s24  ;;  %s62_s28 = sadd.s32 1, %s2156_s19 }
  0x39   : > { %p60_p6 = scmp.eq.s32.totalorder %s59_s30, 0  ;;  %p69_p12 = scmp.ne.s32.totalorder %s2156_s19, %s2152_s18 }
  0x3a   : > { %p70_p5 = scmp.eq.s32.totalorder %s2160_s20, 0  ;;  %p1897_p3 = scmp.lt.s32.totalorder %s2160_s20, 2 }
  0x3b   : > { %s2326_s26 = scalar_select %p60_p6, %s2156_s19, %s62_s28  }
  0x3c   : > { %p71_p10 = por %p70_p5, %p69_p12  ;;  %p2672_p7 = scmp.eq.s32.totalorder %s2257_s21, 1 }
  0x3d   : > { %1885 = dma.hbm_to_vmem [thread:$0]  (!%p2285_p11), %s2670_s7, 16, %s348_s13, [#allocation9]  }
  0x3e   : > { %2671 = sst [smem:[#allocation17_spill]] %s2326_s26  ;;  %p2330_p1 = por %p2672_p7, %p69_p12 }
  0x3f   : > { %s374_s12 = sand.u32 1, %s2156_s19   ;;  %s1669_s14 = sshll.u32 %s2160_s20, 6 }
  0x40   : > { %s2673_s29 = scalar_select %p2330_p1, 1, 0 }
  0x41   : > { %s1668_s13 = sshll.u32 %s374_s12, 2  ;;  %s2339_s16 = scalar_lea.hbm %s2642_s1, %s1669_s14 }
  0x42   : > { %s378_s22 = scalar_lea.vmem [#allocation2], %s1668_s13  ;;  %p2341_p11 = pnand %p1897_p3, %p71_p10 }
  0x43   : > { %s385_s30 = sshll.u32 %s378_s22, 4  ;;  %s375_s4 = scalar_lea.sflag [#allocation3], %s374_s12  ;;  %s386_s30 = int_to_ptr.vmem [resolvable:$true] %s385_s30 }
  0x44   : > { %s2060_s5 = scalar_lea.hbm %s2339_s16, 64  ;;  %p2062_p13 = pneg %p2341_p11 }
  0x45   : > { %p2061_p9 = scmp.ne.s32.totalorder %s2339_s16, %s2060_s5  ;;  %s2065_s15 = scalar_lea.hbm %s2642_s1, 128 }
  0x46   : > { %p2066_p6 = scmp.lt.s32.totalorder %s2339_s16, %s2642_s1  ;;  %p2067_p12 = scmp.lt.s32.totalorder %s2065_s15, %s2060_s5 }
  0x47   : > { %p2063_p2 = pnand %p2062_p13, %p2061_p9 }
  0x48   : > { %p2068_p5 = por %p2067_p12, %p2066_p6 }
  0x49   : > { %p2064_p0 = pneg %p2063_p2 }
  0x4b   : > { %p2069_p3 = pnand %p2068_p5, %p2064_p0 }
  0x4d   : > { %2072 = shalt.err (!%p2069_p3)
}
  0x4e   : > { %s2073_s22 = scalar_lea.vmem %s386_s30, 64  ;;  %s2167_s12 = smov [#allocation2]  }
  0x4f   : > { %p2074_p10 = scmp.ne.s32.totalorder %s386_s30, %s2073_s22  ;;  %s2078_s26 = sshll.u32 %s2167_s12, 4  ;;  %s2079_s26 = int_to_ptr.vmem [resolvable:$false] %s2078_s26 }
  0x50   : > { %s2080_s19 = scalar_lea.vmem %s2079_s26, 128  ;;  %p2081_p9 = scmp.lt.s32.totalorder %s386_s30, %s2079_s26 }
  0x51   : > { %p2076_p7 = pnand %p2074_p10, %p2062_p13  ;;  %p2082_p2 = scmp.lt.s32.totalorder %s2080_s19, %s2073_s22 }
  0x53   : > { %p2077_p1 = pneg %p2076_p7  ;;  %p2083_p4 = por %p2082_p2, %p2081_p9 }
  0x55   : > { %p2084_p8 = pnand %p2083_p4, %p2077_p1 }
  0x57   : > { %2087 = shalt.err (!%p2084_p8)
}
  0x58   : > { %1889 = dma.hbm_to_vmem [thread:$0]  (!%p2341_p11), %s2339_s16, 64, %s386_s30, %s375_s4  }
  0x59   : > { %p2675_p0 = scmp.ne.s32.totalorder %s2666_s25, 0 }
  0x5a   : > { %s2362_s5 = sand.u32 (!%p2675_p0), 1, %s2152_s18   ;;  %p2676_p13 = scmp.ne.s32.totalorder (!%p2675_p0), %s2663_s23, 0 }
  0x5b   : > { %394 = sbr.rel (%p2675_p0) target bundleno = 3152 (0xc50), region = 64  ;;  %s1671_s7 = sshll.u32 (!%p2675_p0), %s2362_s5, 2 }
  0x5c   : > { %s397_s14 = scalar_lea.sflag (!%p2675_p0), [#allocation3], %s2362_s5  ;;  %s2366_s26 = scalar_lea.vmem (!%p2675_p0), [#allocation2], %s1671_s7 }
  0x60   : > { %2131 = dma.done.wait (%p2676_p13), %s397_s14, 64  }
  0x61   : > { %2133 = vsyncadd (%p2676_p13), %s397_s14, 4294967232  ;;  %p2677_p4 = scmp.eq.s32.totalorder %s2257_s21, 0 }
  0x63   : > { %2135 = dma.done.wait (%p2677_p4), [#allocation6], 272   ;;  %p2678_p8 = pmov %p2677_p4 }
  0x64   : > { %p2679_p1 = pmov %p2677_p4 }
  0x65   : > { %2137 = vsyncadd (%p2678_p8), [#allocation6], 4294967024 }
  0x66   : > { %2139 = dma.done.wait (%p2679_p1), [#allocation9], 16   ;;  %p2680_p11 = pmov %p2679_p1 }
  0x67   : > { %p455_p6 = scmp.lt.s32.totalorder %s2257_s21, 1  ;;  %vm478_vm0 = vcmask 261120   ;;  %v1946_v7 = vld [vmem:[%s2643_s2 + $0x8] sm:$0xff]   ;;  %v2168_v8 = vmov 0.0   ;;  %vm2169_vm1 = vmmov 0   ;;  %v1947_v9 = vld [vmem:[%s2643_s2] sm:$0xff]  }
  0x68   : > { %2141 = vsyncadd (%p2680_p11), [#allocation9], 4294967280  ;;  %1760 = vmatprep.subr.bf16.mxu1 %v2168_v8  ;;  %1764 = vmatprep.mubr.msk.bf16.mxu1 %vm2169_vm1, %v2168_v8  ;;  %v1681_v14 = vld [vmem:[%s2649_s8] ss:$0 sm:$0xff]  ;;  %v1682_v16 = vld [vmem:[%s2649_s8 + $0x1] ss:$0 sm:$0xff] }
  0x69   : > { %s456_s4 = scalar_select %p455_p6, %s2257_s21, 1  ;;  %1761 = vmatpush3.bf16.msra.mxu1 %v1946_v7  ;;  %1774 = vmatprep.subr.bf16.mxu0 %v2168_v8  ;;  %vm580_vm2 = vcmask 64512   ;;  %v461_v39 = vld [vmem:[%s2366_s26] sm:$0xf]  ;;  %vm836_vm3 = vcmask 1043456   ;;  %vm1426_vm4 = vcmask 523264  }
  0x6a   : > { %1762 = vmatprep.subr.bf16.mxu1 %v2168_v8  ;;  %1776 = vmatprep.mubr.msk.bf16.mxu0 %vm2169_vm1, %v2168_v8  ;;  %s2170_s14 = smov 104   ;;  %s2173_s25 = smov 96   ;;  %v462_v40 = vunpack.c.l.bf16 %v461_v39 }
  0x6b   : > { %s1676_s19 = sshll.u32 %s456_s4, 3  ;;  %s2171_s4 = smov 120  }
  0x6c   : > { %s458_s16 = scalar_lea.vmem %s2641_s0, %s1676_s19  ;;  %s2172_s19 = smov 112  }
  0x6d   : > { %v2385_v0 = vld [vmem:[%s458_s16] sm:$0xff]  ;;  %1763 = vmatpush3.bf16.msra.mxu1 %v1947_v9  ;;  %s2174_s26 = smov 64   ;;  %s1538_s30 = scalar_lea.sflag [#allocation4], %s2362_s5 }
  0x6e   : > { %v479_v1 = vsel %vm478_vm0, %v2385_v0, 0.0  ;;  %1768 = vmatprep.subr.bf16.mxu1 %v2168_v8  ;;  %p2681_p5 = scmp.ne.s32.totalorder %s2673_s29, 0 }
  0x6f   : > { %480 = vadd.xlane.f32.xlu0 %v479_v1 }
  0xf8   : > { %v481_v2 = vpop.xlane.xlu0 %480 }
  0xf9   : > { %v483_v3 = vmul.f32 0.03125, %v481_v2 }
  0xfb   : > { %v484_v4 = vsub.f32 %v2385_v0, %v483_v3 }
  0xfd   : > { %v485_v5 = vmul.f32 %v484_v4, %v484_v4 }
  0xff   : > { %v486_v6 = vsel %vm478_vm0, %v485_v5, 0.0 }
 0x100   : > { %487 = vadd.xlane.f32.xlu0 %v486_v6 }
 0x189   : > { %v488_v10 = vpop.xlane.xlu0 %487 }
 0x18a   : > { %v489_v11 = vmul.f32 0.03125, %v488_v10 }
 0x18c   : > { %v490_v12 = vadd.f32 1e-05, %v489_v11 }
 0x18e   : > { %1954 = vrsqrt.f32 %v490_v12 }
 0x19b   : > { %v1955_v13 = vpop.eup %1954 }
 0x19c   : > { %v492_v15 = vmul.f32 %v1955_v13, %v484_v4 }
 0x19e   : > { %v497_v17 = vmul.f32 %v1681_v14, %v492_v15 }
 0x1a0   : > { %v502_v18 = vadd.f32 %v1682_v16, %v497_v17 }
 0x1a2   : > { %v503_v19 = vpack.c.bf16 %v502_v18, %v502_v18 }
 0x1a4   : > { %1765 = vmatmul.mubr.msk.bf16.vlgmr.msra.gmra.mxu1 %vm478_vm0, %v503_v19 }
 0x1a5   : > { %1770 = vmatprep.mubr.msk.bf16.mxu1 %vm2169_vm1, %v2168_v8 }
 0x264   : > { %v2414_v20 = vpop.f32.mrf.mxu1 }
 0x265   : > { %570 = vrot.lane.b32.xlu0 %v2414_v20, %s2170_s14  ;;  %564 = vrot.lane.b32.xlu1 %v2414_v20, %s2171_s4  ;;  %v573_v24 = vpack.c.bf16 %v2414_v20, %v2414_v20  ;;  %v818_v2 = vmul.f32 0.35355338, %v2414_v20  ;;  %s1675_s14 = sshll.u32 %s2362_s5, 3  ;;  %s1722_s4 = sshll.u32 %s2257_s21, 7 }
 0x266   : > { %v1766_v21 = vpop.f32.mrf.mxu1  ;;  %s2603_s16 = scalar_lea.hbm %s2652_s11, %s1722_s4  ;;  %s2175_s21 = smov [#allocation10]  }
 0x267   : > { %v826_v3 = vpack.c.bf16 %v818_v2, %v818_v2  ;;  %s2092_s27 = sshll.u32 %s2175_s21, 4  ;;  %s2093_s27 = int_to_ptr.vmem [resolvable:$false] %s2092_s27 }
 0x268   : > { %v560_v22 = vpop.f32.mrf.mxu1  ;;  %s2094_s15 = scalar_lea.vmem %s2093_s27, 256 }
 0x269   : > { %567 = vrot.lane.b32.xlu1 %v2414_v20, %s2172_s19  ;;  %s454_s19 = scalar_lea.vmem [#allocation10], %s1675_s14 }
 0x26a   : > { %v1767_v23 = vpop.f32.mrf.mxu1 }
 0x26d   : > { %578 = vrot.lane.b32.xlu1 %v573_v24, %s2173_s25 }
 0x2d7   : > { %v2421_v25 = vpop.permute.xlu1 %564  ;;  %v2429_v29 = vpop.permute.xlu0 %570 }
 0x2d8   : > { %v574_v26 = vpack.c.bf16 %v2421_v25, %v2421_v25  ;;  %v576_v31 = vpack.c.bf16 %v2429_v29, %v2429_v29 }
 0x2da   : > { %628 = vrot.lane.b32.xlu1 %v574_v26, %s2173_s25 }
 0x2db   : > { %v2425_v27 = vpop.permute.xlu1 %567 }
 0x2dc   : > { %v575_v28 = vpack.c.bf16 %v2425_v27, %v2425_v27 }
 0x2de   : > { %677 = vrot.lane.b32.xlu1 %v575_v28, %s2173_s25 }
 0x2df   : > { %v579_v30 = vpop.permute.xlu1 %578 }
 0x2e0   : > { %v585_v32 = vsel %vm580_vm2, %v579_v30, 0  ;;  %v820_v30 = vmul.f32 0.35355338, %v2425_v27 }
 0x2e1   : > { %1769 = vmatpush3.bf16.xpose.msra.mxu1 %v585_v32 }
 0x2e2   : > { %726 = vrot.lane.b32.xlu1 %v576_v31, %s2173_s25  ;;  %1780 = vmatprep.subr.bf16.mxu1 %v2168_v8  ;;  %v828_v32 = vpack.c.bf16 %v820_v30, %v820_v30  ;;  %s1551_s25 = sshll.u32 %s454_s19, 4  ;;  %s1552_s25 = int_to_ptr.vmem [resolvable:$true] %s1551_s25 }
 0x2e3   : > { %s2088_s28 = scalar_lea.vmem %s1552_s25, 128  ;;  %p2095_p7 = scmp.lt.s32.totalorder %s1552_s25, %s2093_s27 }
 0x2e4   : > { %p2089_p12 = scmp.ne.s32.totalorder %s1552_s25, %s2088_s28  ;;  %p2096_p9 = scmp.lt.s32.totalorder %s2094_s15, %s2088_s28 }
 0x2e6   : > { %p2090_p3 = pnand %p2089_p12, %p2681_p5  ;;  %p2097_p2 = por %p2096_p9, %p2095_p7 }
 0x2e8   : > { %1771 = vmatmul.mubr.msk.bf16.vlgmr.msra.gmra.mxu1 %vm580_vm2, %v573_v24  ;;  %p2091_p10 = pneg %p2090_p3 }
 0x2e9   : > { %1782 = vmatprep.mubr.msk.bf16.mxu1 %vm2169_vm1, %v2168_v8 }
 0x2ea   : > { %p2098_p0 = pnand %p2097_p2, %p2091_p10 }
 0x34c   : > { %v629_v33 = vpop.permute.xlu1 %628 }
 0x34d   : > { %v634_v34 = vsel %vm580_vm2, %v629_v33, 0 }
 0x34e   : > { %1775 = vmatpush3.bf16.xpose.msra.mxu0 %v634_v34  ;;  %v819_v34 = vmul.f32 0.35355338, %v2421_v25 }
 0x34f   : > { %1786 = vmatprep.subr.bf16.mxu0 %v2168_v8 }
 0x350   : > { %v678_v35 = vpop.permute.xlu1 %677 }
 0x351   : > { %v683_v36 = vsel %vm580_vm2, %v678_v35, 0  ;;  %v827_v35 = vpack.c.bf16 %v819_v34, %v819_v34 }
 0x352   : > { %1781 = vmatpush3.bf16.xpose.msra.mxu1 %v683_v36 }
 0x353   : > { %1792 = vmatprep.subr.bf16.mxu1 %v2168_v8 }
 0x354   : > { %v727_v37 = vpop.permute.xlu1 %726 }
 0x355   : > { %v732_v38 = vsel %vm580_vm2, %v727_v37, 0  ;;  %1777 = vmatmul.mubr.msk.bf16.vlgmr.msra.gmra.mxu0 %vm580_vm2, %v574_v26 }
 0x356   : > { %1787 = vmatpush3.bf16.xpose.msra.mxu0 %v732_v38  ;;  %1788 = vmatprep.mubr.msk.bf16.mxu0 %vm2169_vm1, %v2168_v8 }
 0x357   : > { %1798 = vmatprep.subr.bf16.mxu0 %v2168_v8 }
 0x359   : > { %1783 = vmatmul.mubr.msk.bf16.vlgmr.msra.gmra.mxu1 %vm580_vm2, %v575_v28 }
 0x35a   : > { %1794 = vmatprep.mubr.msk.bf16.mxu1 %vm2169_vm1, %v2168_v8 }
 0x35d   : > { %1789 = vmatmul.mubr.msk.bf16.vlgmr.msra.gmra.mxu0 %vm580_vm2, %v576_v31  ;;  %v821_v31 = vmul.f32 0.35355338, %v2429_v29 }
 0x35e   : > { %1800 = vmatprep.mubr.msk.bf16.mxu0 %vm2169_vm1, %v2168_v8 }
 0x35f   : > { %v829_v33 = vpack.c.bf16 %v821_v31, %v821_v31 }
 0x3a8   : > { %v621_v41 = vpop.f32.mrf.mxu1 }
 0x3a9   : > { %v622_v42 = vadd.f32 %v621_v41, %v462_v40 }
 0x3aa   : > { %v1772_v43 = vpop.f32.mrf.mxu1 }
 0x3ab   : > { %v774_v44 = vsel %vm580_vm2, %v622_v42, -inf }
 0x3ac   : > { %775 = vmax.xlane.f32.xlu1 %v774_v44  ;;  %v624_v45 = vpop.f32.mrf.mxu1 }
 0x3ae   : > { %v1773_v46 = vpop.f32.mrf.mxu1 }
 0x415   : > { %v670_v47 = vpop.f32.mrf.mxu0 }
 0x416   : > { %v671_v48 = vadd.f32 %v670_v47, %v462_v40 }
 0x417   : > { %v1778_v49 = vpop.f32.mrf.mxu0 }
 0x418   : > { %v777_v50 = vsel %vm580_vm2, %v671_v48, -inf }
 0x419   : > { %778 = vmax.xlane.f32.xlu0 %v777_v50  ;;  %v673_v51 = vpop.f32.mrf.mxu0  ;;  %v719_v52 = vpop.f32.mrf.mxu1 }
 0x41a   : > { %v720_v53 = vadd.f32 %v719_v52, %v462_v40 }
 0x41b   : > { %v1779_v54 = vpop.f32.mrf.mxu0  ;;  %v1784_v55 = vpop.f32.mrf.mxu1 }
 0x41c   : > { %v780_v56 = vsel %vm580_vm2, %v720_v53, -inf }
 0x41d   : > { %v768_v57 = vpop.f32.mrf.mxu0  ;;  %781 = vmax.xlane.f32.xlu1 %v780_v56  ;;  %v722_v58 = vpop.f32.mrf.mxu1 }
 0x41e   : > { %v769_v59 = vadd.f32 %v768_v57, %v462_v40 }
 0x41f   : > { %v1785_v60 = vpop.f32.mrf.mxu1  ;;  %v1790_v61 = vpop.f32.mrf.mxu0 }
 0x420   : > { %v783_v62 = vsel %vm580_vm2, %v769_v59, -inf }
 0x421   : > { %784 = vmax.xlane.f32.xlu0 %v783_v62  ;;  %v771_v63 = vpop.f32.mrf.mxu0 }
 0x423   : > { %v1791_v1 = vpop.f32.mrf.mxu0 }
 0x42e   : > { %831 = vrot.lane.b32.xlu1 %v826_v3, %s2174_s26 }
 0x435   : > { %v776_v4 = vpop.xlane.xlu1 %775 }
 0x436   : > { %v786_v5 = vsub.f32 %v622_v42, %v776_v4 }
 0x438   : > { %v790_v6 = vmul.f32 1.442695, %v786_v5 }
 0x43a   : > { %1956 = vpow2.f32 %v790_v6 }
 0x447   : > { %v1957_v7 = vpop.eup %1956 }
 0x448   : > { %v798_v9 = vsel %vm580_vm2, %v1957_v7, 0.0 }
 0x452   : > { %799 = vadd.xlane.f32.xlu1 %v798_v9 }
 0x4a2   : > { %v779_v10 = vpop.xlane.xlu0 %778 }
 0x4a3   : > { %v787_v11 = vsub.f32 %v671_v48, %v779_v10 }
 0x4a5   : > { %v792_v12 = vmul.f32 1.442695, %v787_v11 }
 0x4a6   : > { %v782_v13 = vpop.xlane.xlu1 %781 }
 0x4a7   : > { %1958 = vpow2.f32 %v792_v12  ;;  %v788_v14 = vsub.f32 %v720_v53, %v782_v13 }
 0x4a9   : > { %v794_v15 = vmul.f32 1.442695, %v788_v14 }
 0x4aa   : > { %v785_v16 = vpop.xlane.xlu0 %784  ;;  %v832_v17 = vpop.permute.xlu1 %831 }
 0x4ab   : > { %1960 = vpow2.f32 %v794_v15  ;;  %v789_v18 = vsub.f32 %v769_v59, %v785_v16  ;;  %v838_v19 = vsel %vm836_vm3, %v832_v17, 0 }
 0x4ac   : > { %1793 = vmatpush3.bf16.msra.mxu1 %v838_v19 }
 0x4ad   : > { %v796_v20 = vmul.f32 1.442695, %v789_v18  ;;  %1804 = vmatprep.subr.bf16.mxu1 %v2168_v8 }
 0x4af   : > { %1962 = vpow2.f32 %v796_v20 }
 0x4b4   : > { %v1959_v21 = vpop.eup %1958 }
 0x4b5   : > { %v801_v22 = vsel %vm580_vm2, %v1959_v21, 0.0 }
 0x4b6   : > { %802 = vadd.xlane.f32.xlu0 %v801_v22 }
 0x4b8   : > { %v1961_v23 = vpop.eup %1960 }
 0x4b9   : > { %v804_v24 = vsel %vm580_vm2, %v1961_v23, 0.0 }
 0x4ba   : > { %805 = vadd.xlane.f32.xlu1 %v804_v24 }
 0x4bc   : > { %v1963_v26 = vpop.eup %1962 }
 0x4bd   : > { %v807_v28 = vsel %vm580_vm2, %v1963_v26, 0.0 }
 0x4be   : > { %808 = vadd.xlane.f32.xlu0 %v807_v28 }
 0x4cb   : > { %930 = vrot.lane.b32.xlu1 %v828_v32, %s2174_s26 }
 0x4cf   : > { %979 = vrot.lane.b32.xlu1 %v829_v33, %s2174_s26 }
 0x4d4   : > { %881 = vrot.lane.b32.xlu0 %v827_v35, %s2174_s26 }
 0x4db   : > { %v800_v36 = vpop.xlane.xlu1 %799 }
 0x4dc   : > { %1964 = vrcp.f32 %v800_v36  ;;  %v1133_v36 = vld [vmem:[%s2644_s3] sm:$0xf] }
 0x4e9   : > { %v1965_v37 = vpop.eup %1964 }
 0x4ea   : > { %v814_v38 = vmul.f32 %v1965_v37, %v1957_v7  ;;  %v1134_v37 = vld [vmem:[%s2644_s3 + $0x4] sm:$0xf] }
 0x4ec   : > { %v822_v39 = vpack.c.bf16 %v814_v38, %v814_v38  ;;  %v1141_v38 = vsel %vm836_vm3, %v1133_v36, 0 }
 0x4ee   : > { %1795 = vmatmul.mubr.msk.bf16.vlgmr.msra.gmra.mxu1 %vm580_vm2, %v822_v39  ;;  %v1187_v39 = vsel %vm836_vm3, %v1134_v37, 0 }
 0x4ef   : > { %1806 = vmatprep.mubr.msk.bf16.mxu1 %vm2169_vm1, %v2168_v8 }
 0x53f   : > { %v803_v27 = vpop.xlane.xlu0 %802 }
 0x540   : > { %1966 = vrcp.f32 %v803_v27 }
 0x543   : > { %v806_v29 = vpop.xlane.xlu1 %805 }
 0x544   : > { %1968 = vrcp.f32 %v806_v29 }
 0x547   : > { %v809_v25 = vpop.xlane.xlu0 %808  ;;  %v931_v40 = vpop.permute.xlu1 %930 }
 0x548   : > { %1970 = vrcp.f32 %v809_v25  ;;  %v936_v41 = vsel %vm836_vm3, %v931_v40, 0 }
 0x549   : > { %1805 = vmatpush3.bf16.msra.mxu1 %v936_v41 }
 0x54a   : > { %1816 = vmatprep.subr.bf16.mxu1 %v2168_v8 }
 0x54b   : > { %v882_v42 = vpop.permute.xlu0 %881  ;;  %v980_v46 = vpop.permute.xlu1 %979 }
 0x54c   : > { %v887_v43 = vsel %vm836_vm3, %v882_v42, 0  ;;  %v985_v49 = vsel %vm836_vm3, %v980_v46, 0 }
 0x54d   : > { %v1967_v44 = vpop.eup %1966  ;;  %1799 = vmatpush3.bf16.msra.mxu0 %v887_v43 }
 0x54e   : > { %1810 = vmatprep.subr.bf16.mxu0 %v2168_v8  ;;  %v815_v45 = vmul.f32 %v1967_v44, %v1959_v21 }
 0x550   : > { %v823_v47 = vpack.c.bf16 %v815_v45, %v815_v45 }
 0x551   : > { %v1969_v48 = vpop.eup %1968 }
 0x552   : > { %1801 = vmatmul.mubr.msk.bf16.vlgmr.msra.gmra.mxu0 %vm580_vm2, %v823_v47  ;;  %v816_v50 = vmul.f32 %v1969_v48, %v1961_v23  ;;  %v1694_v47 = vld [vmem:[%s2650_s9] ss:$0 sm:$0xff]  ;;  %v1695_v48 = vld [vmem:[%s2650_s9 + $0x1] ss:$0 sm:$0xff] }
 0x553   : > { %1811 = vmatpush3.bf16.msra.mxu0 %v985_v49  ;;  %1812 = vmatprep.mubr.msk.bf16.mxu0 %vm2169_vm1, %v2168_v8 }
 0x554   : > { %v824_v51 = vpack.c.bf16 %v816_v50, %v816_v50  ;;  %1822 = vmatprep.subr.bf16.mxu0 %v2168_v8 }
 0x555   : > { %v1971_v52 = vpop.eup %1970 }
 0x556   : > { %1807 = vmatmul.mubr.msk.bf16.vlgmr.msra.gmra.mxu1 %vm580_vm2, %v824_v51  ;;  %v817_v53 = vmul.f32 %v1971_v52, %v1963_v26  ;;  %v1698_v51 = vld [vmem:[%s2650_s9 + $0x4] ss:$0 sm:$0xff]  ;;  %v1699_v52 = vld [vmem:[%s2650_s9 + $0x5] ss:$0 sm:$0xff] }
 0x557   : > { %1818 = vmatprep.mubr.msk.bf16.mxu1 %vm2169_vm1, %v2168_v8  ;;  %1817 = vmatpush3.bf16.msra.mxu1 %v1141_v38 }
 0x558   : > { %v825_v54 = vpack.c.bf16 %v817_v53, %v817_v53  ;;  %1828 = vmatprep.subr.bf16.mxu1 %v2168_v8 }
 0x55a   : > { %1813 = vmatmul.mubr.msk.bf16.vlgmr.msra.gmra.mxu0 %vm580_vm2, %v825_v54 }
 0x55b   : > { %1824 = vmatprep.mubr.msk.bf16.mxu0 %vm2169_vm1, %v2168_v8  ;;  %1823 = vmatpush3.bf16.msra.mxu0 %v1187_v39 }
 0x55c   : > { %1834 = vmatprep.subr.bf16.mxu0 %v2168_v8 }
 0x5ae   : > { %v874_v55 = vpop.f32.mrf.mxu1 }
 0x5af   : > { %v1027_v56 = vsel %vm580_vm2, %v874_v55, 0.0 }
 0x5b0   : > { %1028 = vadd.xlane.f32.xlu0 %v1027_v56  ;;  %v1796_v57 = vpop.f32.mrf.mxu1  ;;  %v1136_v56 = vld [vmem:[%s2644_s3 + $0xc] sm:$0xf] }
 0x5b2   : > { %v877_v58 = vpop.f32.mrf.mxu1 }
 0x5b4   : > { %v1797_v59 = vpop.f32.mrf.mxu1 }
 0x5b5   : > { %v1696_v59 = vld [vmem:[%s2650_s9 + $0x2] ss:$0 sm:$0xff] }
 0x612   : > { %v923_v60 = vpop.f32.mrf.mxu0 }
 0x613   : > { %v1030_v61 = vsel %vm580_vm2, %v923_v60, 0.0 }
 0x614   : > { %v1802_v62 = vpop.f32.mrf.mxu0  ;;  %1031 = vadd.xlane.f32.xlu1 %v1030_v61 }
 0x616   : > { %v926_v63 = vpop.f32.mrf.mxu0  ;;  %v972_v1 = vpop.f32.mrf.mxu1 }
 0x617   : > { %v1033_v2 = vsel %vm580_vm2, %v972_v1, 0.0 }
 0x618   : > { %v1803_v3 = vpop.f32.mrf.mxu0  ;;  %1034 = vadd.xlane.f32.xlu0 %v1033_v2  ;;  %v1808_v4 = vpop.f32.mrf.mxu1 }
 0x61a   : > { %v975_v5 = vpop.f32.mrf.mxu1  ;;  %v1021_v6 = vpop.f32.mrf.mxu0 }
 0x61b   : > { %v1036_v7 = vsel %vm580_vm2, %v1021_v6, 0.0 }
 0x61c   : > { %v1814_v9 = vpop.f32.mrf.mxu0  ;;  %1037 = vadd.xlane.f32.xlu0 %v1036_v7  ;;  %v1809_v10 = vpop.f32.mrf.mxu1  ;;  %v1701_v7 = vld [vmem:[%s2650_s9 + $0x7] ss:$0 sm:$0xff] }
 0x61e   : > { %v1024_v11 = vpop.f32.mrf.mxu0 }
 0x620   : > { %v1815_v12 = vpop.f32.mrf.mxu0 }
 0x639   : > { %v1029_v13 = vpop.xlane.xlu0 %1028 }
 0x69d   : > { %v1032_v14 = vpop.xlane.xlu1 %1031 }
 0x69e   : > { %v1039_v16 = vadd.f32 %v1032_v14, %v1029_v13 }
 0x6a1   : > { %v1035_v15 = vpop.xlane.xlu0 %1034 }
 0x6a2   : > { %v1040_v17 = vadd.f32 %v1039_v16, %v1035_v15 }
 0x6a5   : > { %v1038_v18 = vpop.xlane.xlu0 %1037 }
 0x6a6   : > { %v1041_v19 = vadd.f32 %v1040_v17, %v1038_v18 }
 0x6a8   : > { %v1042_v20 = vmul.f32 0.03125, %v1041_v19 }
 0x6aa   : > { %v1044_v21 = vsub.f32 %v923_v60, %v1042_v20  ;;  %v1043_v22 = vsub.f32 %v874_v55, %v1042_v20  ;;  %v1046_v23 = vsub.f32 %v1021_v6, %v1042_v20  ;;  %v1045_v24 = vsub.f32 %v972_v1, %v1042_v20  ;;  %v1135_v55 = vld [vmem:[%s2644_s3 + $0x8] sm:$0xf]  ;;  %v1697_v60 = vld [vmem:[%s2650_s9 + $0x3] ss:$0 sm:$0xff]  ;;  %v1700_v6 = vld [vmem:[%s2650_s9 + $0x6] ss:$0 sm:$0xff] }
 0x6ab   : > { %v1233_v63 = vsel %vm836_vm3, %v1135_v55, 0  ;;  %v1279_v1 = vsel %vm836_vm3, %v1136_v56, 0 }
 0x6ac   : > { %v1048_v26 = vmul.f32 %v1044_v21, %v1044_v21  ;;  %v1047_v28 = vmul.f32 %v1043_v22, %v1043_v22  ;;  %v1050_v32 = vmul.f32 %v1046_v23, %v1046_v23  ;;  %v1049_v33 = vmul.f32 %v1045_v24, %v1045_v24 }
 0x6ae   : > { %v1054_v30 = vsel %vm580_vm2, %v1048_v26, 0.0  ;;  %v1051_v31 = vsel %vm580_vm2, %v1047_v28, 0.0  ;;  %v1060_v34 = vsel %vm580_vm2, %v1050_v32, 0.0  ;;  %v1057_v35 = vsel %vm580_vm2, %v1049_v33, 0.0 }
 0x6af   : > { %1055 = vadd.xlane.f32.xlu0 %v1054_v30  ;;  %1052 = vadd.xlane.f32.xlu1 %v1051_v31 }
 0x6b3   : > { %1061 = vadd.xlane.f32.xlu0 %v1060_v34  ;;  %1058 = vadd.xlane.f32.xlu1 %v1057_v35 }
 0x738   : > { %v1056_v27 = vpop.xlane.xlu0 %1055  ;;  %v1053_v29 = vpop.xlane.xlu1 %1052 }
 0x739   : > { %v1063_v25 = vadd.f32 %v1056_v27, %v1053_v29 }
 0x73c   : > { %v1059_v40 = vpop.xlane.xlu1 %1058  ;;  %v1062_v42 = vpop.xlane.xlu0 %1061 }
 0x73d   : > { %v1064_v41 = vadd.f32 %v1063_v25, %v1059_v40 }
 0x73f   : > { %v1065_v43 = vadd.f32 %v1064_v41, %v1062_v42 }
 0x741   : > { %v1066_v44 = vmul.f32 0.03125, %v1065_v43  ;;  %v1948_v43 = vld [vmem:[#allocation5 + $0x8] sm:$0xff]  }
 0x743   : > { %v1067_v45 = vadd.f32 1e-05, %v1066_v44  ;;  %v1949_v44 = vld [vmem:[#allocation5] sm:$0xff]  }
 0x745   : > { %1972 = vrsqrt.f32 %v1067_v45 }
 0x752   : > { %v1973_v46 = vpop.eup %1972 }
 0x753   : > { %v1069_v49 = vmul.f32 %v1973_v46, %v1043_v22  ;;  %v1070_v50 = vmul.f32 %v1973_v46, %v1044_v21  ;;  %v1071_v57 = vmul.f32 %v1973_v46, %v1045_v24  ;;  %v1072_v58 = vmul.f32 %v1973_v46, %v1046_v23 }
 0x755   : > { %v1097_v53 = vmul.f32 %v1694_v47, %v1069_v49  ;;  %v1098_v54 = vmul.f32 %v1695_v48, %v1070_v50  ;;  %v1099_v4 = vmul.f32 %v1696_v59, %v1071_v57  ;;  %v1100_v5 = vmul.f32 %v1697_v60, %v1072_v58  ;;  %v1706_v48 = vld [vmem:[%s2649_s8 + $0x2] ss:$0 sm:$0xff]  ;;  %v1707_v50 = vld [vmem:[%s2649_s8 + $0x3] ss:$0 sm:$0xff] }
 0x757   : > { %v1125_v61 = vadd.f32 %v1698_v51, %v1097_v53  ;;  %v1126_v62 = vadd.f32 %v1699_v52, %v1098_v54  ;;  %v1127_v9 = vadd.f32 %v1700_v6, %v1099_v4  ;;  %v1128_v10 = vadd.f32 %v1701_v7, %v1100_v5  ;;  %v1708_v54 = vld [vmem:[#allocation7] ss:$0 sm:$0xff] }
 0x759   : > { %v1129_v2 = vpack.c.bf16 %v1125_v61, %v1125_v61  ;;  %v1130_v3 = vpack.c.bf16 %v1126_v62, %v1126_v62  ;;  %v1131_v11 = vpack.c.bf16 %v1127_v9, %v1127_v9  ;;  %v1132_v12 = vpack.c.bf16 %v1128_v10, %v1128_v10  ;;  %v1950_v9 = vld [vmem:[%s2647_s6 + $0x18] sm:$0xff]   ;;  %v1951_v10 = vld [vmem:[%s2647_s6 + $0x10] sm:$0xff]  }
 0x75b   : > { %1819 = vmatmul.mubr.msk.bf16.vlgmr.msra.gmra.mxu1 %vm580_vm2, %v1129_v2  ;;  %1825 = vmatmul.mubr.msk.bf16.vlgmr.msra.gmra.mxu0 %vm580_vm2, %v1130_v3 }
 0x75c   : > { %1829 = vmatpush3.bf16.msra.mxu1 %v1233_v63  ;;  %1835 = vmatpush3.bf16.msra.mxu0 %v1279_v1 }
 0x75d   : > { %1830 = vmatprep.mubr.msk.bf16.mxu1 %vm2169_vm1, %v2168_v8  ;;  %1836 = vmatprep.mubr.msk.bf16.mxu0 %vm2169_vm1, %v2168_v8 }
 0x75e   : > { %1840 = vmatprep.subr.bf16.mxu1 %v2168_v8  ;;  %1848 = vmatprep.subr.bf16.mxu0 %v2168_v8 }
 0x763   : > { %1831 = vmatmul.mubr.msk.bf16.vlgmr.msra.gmra.mxu1 %vm580_vm2, %v1131_v11  ;;  %1837 = vmatmul.mubr.msk.bf16.vlgmr.msra.gmra.mxu0 %vm580_vm2, %v1132_v12  ;;  %v1952_v11 = vld [vmem:[%s2647_s6 + $0x8] sm:$0xff]   ;;  %v1953_v12 = vld [vmem:[%s2647_s6] sm:$0xff]  }
 0x764   : > { %1844 = vmatprep.mubr.msk.bf16.mxu1 %vm2169_vm1, %v2168_v8  ;;  %1856 = vmatprep.mubr.msk.bf16.mxu0 %vm2169_vm1, %v2168_v8 }
 0x765   : > { %1841 = vmatpush3.bf16.msra.mxu1 %v1948_v43  ;;  %1849 = vmatpush3.bf16.msra.mxu0 %v1950_v9 }
 0x766   : > { %1842 = vmatprep.subr.bf16.mxu1 %v2168_v8  ;;  %1850 = vmatprep.subr.bf16.mxu0 %v2168_v8 }
 0x769   : > { %1843 = vmatpush3.bf16.msra.mxu1 %v1949_v44  ;;  %1851 = vmatpush3.bf16.msra.mxu0 %v1951_v10 }
 0x76a   : > { %1852 = vmatprep.subr.bf16.mxu0 %v2168_v8 }
 0x76d   : > { %1853 = vmatpush3.bf16.msra.mxu0 %v1952_v11 }
 0x76e   : > { %1854 = vmatprep.subr.bf16.mxu0 %v2168_v8  ;;  %v1715_v8 = vld [vmem:[#allocation8] ss:$0 sm:$0xff] }
 0x771   : > { %1855 = vmatpush3.bf16.msra.mxu0 %v1953_v12 }
 0x81b   : > { %v1177_v13 = vpop.f32.mrf.mxu1  ;;  %v1223_v14 = vpop.f32.mrf.mxu0 }
 0x81c   : > { %v1321_v19 = vsel %vm478_vm0, %v1177_v13, 0.0  ;;  %v1322_v20 = vsel %vm478_vm0, %v1223_v14, 0.0 }
 0x81d   : > { %v1820_v15 = vpop.f32.mrf.mxu1  ;;  %v1826_v16 = vpop.f32.mrf.mxu0  ;;  %v1323_v23 = vadd.f32 %v1322_v20, %v1321_v19  ;;  %v1714_v19 = vld [vmem:[%s2651_s10 + $0x1] ss:$0 sm:$0xff] }
 0x81f   : > { %v1180_v17 = vpop.f32.mrf.mxu1  ;;  %v1226_v18 = vpop.f32.mrf.mxu0 }
 0x820   : > { %v1713_v17 = vld [vmem:[%s2651_s10] ss:$0 sm:$0xff] }
 0x821   : > { %v1821_v21 = vpop.f32.mrf.mxu1  ;;  %v1827_v22 = vpop.f32.mrf.mxu0 }
 0x823   : > { %v1269_v24 = vpop.f32.mrf.mxu1  ;;  %v1315_v26 = vpop.f32.mrf.mxu0 }
 0x824   : > { %v1324_v28 = vsel %vm478_vm0, %v1269_v24, 0.0  ;;  %v1326_v33 = vsel %vm478_vm0, %v1315_v26, 0.0 }
 0x825   : > { %v1325_v30 = vadd.f32 %v1324_v28, %v1323_v23  ;;  %v1832_v31 = vpop.f32.mrf.mxu1  ;;  %v1838_v32 = vpop.f32.mrf.mxu0 }
 0x827   : > { %v1327_v34 = vadd.f32 %v1326_v33, %v1325_v30  ;;  %v1272_v35 = vpop.f32.mrf.mxu1  ;;  %v1318_v36 = vpop.f32.mrf.mxu0 }
 0x829   : > { %v2559_v37 = vadd.f32 %v1327_v34, %v2385_v0  ;;  %v1833_v38 = vpop.f32.mrf.mxu1  ;;  %v1839_v39 = vpop.f32.mrf.mxu0 }
 0x82b   : > { %v1329_v27 = vsel %vm478_vm0, %v2559_v37, 0.0 }
 0x82c   : > { %1330 = vadd.xlane.f32.xlu1 %v1329_v27 }
 0x8b5   : > { %v1331_v29 = vpop.xlane.xlu1 %1330 }
 0x8b6   : > { %v1332_v25 = vmul.f32 0.03125, %v1331_v29 }
 0x8b8   : > { %v1333_v40 = vsub.f32 %v2559_v37, %v1332_v25 }
 0x8ba   : > { %v1334_v41 = vmul.f32 %v1333_v40, %v1333_v40 }
 0x8bc   : > { %v1335_v42 = vsel %vm478_vm0, %v1334_v41, 0.0 }
 0x8bd   : > { %1336 = vadd.xlane.f32.xlu0 %v1335_v42 }
 0x946   : > { %v1337_v0 = vpop.xlane.xlu0 %1336 }
 0x947   : > { %v1338_v45 = vmul.f32 0.03125, %v1337_v0 }
 0x949   : > { %v1339_v46 = vadd.f32 1e-05, %v1338_v45 }
 0x94b   : > { %1974 = vrsqrt.f32 %v1339_v46 }
 0x958   : > { %v1975_v47 = vpop.eup %1974 }
 0x959   : > { %v1341_v49 = vmul.f32 %v1975_v47, %v1333_v40 }
 0x95b   : > { %v1346_v51 = vmul.f32 %v1706_v48, %v1341_v49 }
 0x95d   : > { %v1351_v52 = vadd.f32 %v1707_v50, %v1346_v51 }
 0x95f   : > { %v1352_v53 = vpack.c.bf16 %v1351_v52, %v1351_v52 }
 0x961   : > { %1845 = vmatmul.mubr.msk.bf16.vlgmr.msra.gmra.mxu1 %vm478_vm0, %v1352_v53 }
 0xa21   : > { %v1413_v55 = vpop.f32.mrf.mxu1 }
 0xa22   : > { %v1414_v56 = vadd.f32 %v1708_v54, %v1413_v55 }
 0xa23   : > { %v1846_v57 = vpop.f32.mrf.mxu1 }
 0xa24   : > { %v1712_v58 = vmul.f32 -1.442695, %v1414_v56 }
 0xa25   : > { %v1416_v59 = vpop.f32.mrf.mxu1 }
 0xa26   : > { %1976 = vpow2.f32 %v1712_v58 }
 0xa27   : > { %v1847_v60 = vpop.f32.mrf.mxu1 }
 0xa33   : > { %v1977_v61 = vpop.eup %1976 }
 0xa34   : > { %v1422_v62 = vadd.f32 1.0, %v1977_v61 }
 0xa36   : > { %1978 = vrcp.f32 %v1422_v62 }
 0xa43   : > { %v1979_v63 = vpop.eup %1978 }
 0xa44   : > { %v1425_v1 = vmul.f32 %v1979_v63, %v1414_v56 }
 0xa46   : > { %v1427_v2 = vsel %vm1426_vm4, %v1425_v1, 0.0 }
 0xa47   : > { %1428 = vadd.xlane.f32.xlu1 %v1427_v2 }
 0xad0   : > { %v1429_v3 = vpop.xlane.xlu1 %1428 }
 0xad1   : > { %v1431_v4 = vmul.f32 0.015625, %v1429_v3 }
 0xad3   : > { %v1432_v5 = vsub.f32 %v1425_v1, %v1431_v4 }
 0xad5   : > { %v1433_v6 = vmul.f32 %v1432_v5, %v1432_v5 }
 0xad7   : > { %v1434_v7 = vsel %vm1426_vm4, %v1433_v6, 0.0 }
 0xad8   : > { %1435 = vadd.xlane.f32.xlu0 %v1434_v7 }
 0xb61   : > { %v1436_v13 = vpop.xlane.xlu0 %1435 }
 0xb62   : > { %v1437_v14 = vmul.f32 0.015625, %v1436_v13 }
 0xb64   : > { %v1438_v15 = vadd.f32 1e-05, %v1437_v14 }
 0xb66   : > { %1980 = vrsqrt.f32 %v1438_v15 }
 0xb73   : > { %v1981_v16 = vpop.eup %1980 }
 0xb74   : > { %v1440_v18 = vmul.f32 %v1981_v16, %v1432_v5 }
 0xb76   : > { %v1445_v20 = vmul.f32 %v1713_v17, %v1440_v18 }
 0xb78   : > { %v1450_v21 = vadd.f32 %v1714_v19, %v1445_v20 }
 0xb7a   : > { %v1451_v22 = vpack.c.bf16 %v1450_v21, %v1450_v21 }
 0xb7c   : > { %1857 = vmatmul.mubr.msk.bf16.vlgmr.msra.gmra.mxu0 %vm1426_vm4, %v1451_v22 }
 0xc3c   : > { %v1528_v23 = vpop.f32.mrf.mxu0 }
 0xc3d   : > { %v1529_v24 = vadd.f32 %v1715_v8, %v1528_v23 }
 0xc3e   : > { %v1858_v26 = vpop.f32.mrf.mxu0 }
 0xc3f   : > { %v1534_v28 = vadd.f32 %v1529_v24, %v2559_v37 }
 0xc40   : > { %v1531_v30 = vpop.f32.mrf.mxu0 }
 0xc41   : > { %v1535_v31 = vadd.f32 %v1534_v28, %v1351_v52 }
 0xc42   : > { %v1859_v32 = vpop.f32.mrf.mxu0 }
 0xc43   : > { %1536 = vst.msk [vmem:[%s454_s19] sm:$0xff] %vm478_vm0, %v1535_v31 }
 0xc44   : > { %2101 = shalt.err (!%p2098_p0)
}
 0xc45   : > { %s2102_s13 = scalar_lea.hbm %s2603_s16, 128  ;;  %s2106_s12 = scalar_lea.hbm %s2652_s11, 256 }
 0xc46   : > { %p2103_p13 = scmp.ne.s32.totalorder %s2603_s16, %s2102_s13  ;;  %p2107_p1 = scmp.lt.s32.totalorder %s2603_s16, %s2652_s11 }
 0xc47   : > { %p2108_p11 = scmp.lt.s32.totalorder %s2106_s12, %s2102_s13 }
 0xc48   : > { %p2104_p4 = pnand %p2103_p13, %p2681_p5 }
 0xc49   : > { %p2109_p6 = por %p2108_p11, %p2107_p1 }
 0xc4a   : > { %p2105_p8 = pneg %p2104_p4 }
 0xc4c   : > { %p2110_p12 = pnand %p2109_p6, %p2105_p8 }
 0xc4e   : > { %2113 = shalt.err (!%p2110_p12)
}
 0xc4f   : > { %1874 = dma.vmem_to_hbm [thread:$0]  (%p2681_p5), %s1552_s25, 128, %s2603_s16, %s1538_s30  }
 0xc50 PF: > { %s2682_s4 = sld [smem:[#allocation16_spill]]  ;;  %s1563_s19 = sand.u32 1, %s2148_s17  }
 0xc51   : > { %p2684_p10 = scmp.ge.s32.totalorder %s2160_s20, 2  ;;  %s1564_s26 = scalar_lea.sflag [#allocation4], %s1563_s19 }
 0xc56   : > { %p2683_p3 = scmp.ne.s32.totalorder %s2682_s4, 0 }
 0xc58   : > { %p1891_p7 = pnand %p2684_p10, %p2683_p3 }
 0xc5a   : > { %p1892_p9 = pneg %p1891_p7 }
 0xc5c   : > { %2143 = dma.done.wait (%p1892_p9), %s1564_s26, 128  }
 0xc5d   : > { %2145 = vsyncadd (%p1892_p9), %s1564_s26, 4294967168  ;;  %s2685_s23 = sld [smem:[#allocation15_spill]]  ;;  %p26_p2 = scmp.ge.s32.totalorder %s2316_s24, 4  }
 0xc5e   : > { %s2686_s19 = sld [smem:[#allocation17_spill]]  ;;  %s2687_s17 = smov %s2152_s18 }
 0xc5f   : > { %s2689_s20 = smov %s2316_s24  ;;  %28 = sbr.rel (!%p26_p2) target bundleno = 11 (0xb), region = 125 }
 0xc63   : > { %s2688_s18 = smov %s2685_s23 }
 0xc64   :  { %1569 = vsyncpa [#allocation3], 1 }
 0xc65   :  { %1571 = vsyncpa [#allocation3 + $0x1], 1 }
 0xc66   :  { %1572 = vsyncpa [#allocation6], 1 }
 0xc67   :  { %1573 = vsyncpa [#allocation9], 1 }
 0xc68   :  { %1574 = vsyncpa [#allocation4], 1 }
 0xc69   :  { %1576 = vsyncpa [#allocation4 + $0x1], 1 }

</bundles_post_ra>
